<compile_context>
chip_gen: v7x
topology: tpu7x:2x2x1
jax: 0.10.0
libtpu: 0.0.40
codegen_flags: <defaults>
</compile_context>

<pallas_src>
import functools

import jax
import jax.numpy as jnp
from jax.experimental import pallas as pl
from jax.experimental.pallas import tpu as pltpu

# ---- synthetic model hyper-params (small) ----
B = 2            # batch
C_IN = 1         # audio channels (mono)
T = 128          # total samples
FRAME = 64       # samples per encode frame (2 frames; codes concatenated on time)
K1, S1, H1 = 4, 4, 16      # conv1: kernel=stride=4, 1 -> 16 channels
K2, S2, D_LAT = 2, 2, 32   # conv2: kernel=stride=2, 16 -> 32 channels (latent dim)
N_Q = 4          # residual VQ codebooks
K_CB = 64        # codebook size
HOP = S1 * S2    # samples per code step (= 8)

_VMEM = pl.BlockSpec(memory_space=pltpu.MemorySpace.VMEM)


# ---------------- single fused Pallas kernel ----------------
def _encodec_fused_kernel(x_ref, w1_ref, b1_ref, w2_ref, b2_ref,
                          cb_ref, cbn_ref, codes_ref, *, n_q, k1, hidden):
    """conv1(+ELU) -> conv2 -> residual VQ, fused; intermediates never leave VMEM.

    x_ref:     [N, 2*k1] f32   one conv2 receptive field (8 samples) per row
    w1_ref:    [k1, hidden]    b1_ref: [1, hidden]
    w2_ref:    [K2, hidden, D] b2_ref: [1, D]
    cb_ref:    [n_q, K_CB, D]  cbn_ref: [n_q, K_CB]  (precomputed ||c||^2)
    codes_ref: [N, n_q] int32
    """
    x = x_ref[...]                                   # [N, 2*k1]
    b1 = b1_ref[...]                                 # [1, hidden]

    # conv1 + ELU as VPU broadcast-FMAs (contraction dim is only 4 -> skip MXU).
    def conv1_elu(off):
        acc = b1                                     # broadcasts to [N, hidden]
        for k in range(k1):                          # static unroll (k1 = 4)
            acc = acc + x[:, off + k:off + k + 1] * w1_ref[k:k + 1, :]
        # TODO(synk): use jnp.expm1 once its Mosaic lowering is confirmed; exp-1
        # matches torch ELU to ~1e-7 at these magnitudes.
        return jnp.where(acc > 0.0, acc, jnp.exp(acc) - 1.0)

    h0 = conv1_elu(0)                                # conv1 window 0  [N, hidden]
    h1 = conv1_elu(k1)                               # conv1 window 1  [N, hidden]

    # conv2 (kernel == stride == 2): latent = h0 @ W2[0] + h1 @ W2[1] + b2
    latent = (b2_ref[...]
              + jnp.dot(h0, w2_ref[0], preferred_element_type=jnp.float32)
              + jnp.dot(h1, w2_ref[1], preferred_element_type=jnp.float32))

    # residual vector quantization (f32 distances; first-argmin tie-break).
    r = latent                                       # [N, D]
    n_rows = r.shape[0]
    k_cb = cb_ref.shape[1]
    lane = jax.lax.broadcasted_iota(jnp.int32, (n_rows, k_cb), 1)
    cols = []
    for q in range(n_q):                             # n_q small & static -> unrolled
        cb = cb_ref[q]                               # [K_CB, D]
        dots = jax.lax.dot_general(r, cb, (((1,), (1,)), ((), ())),
                                   preferred_element_type=jnp.float32)   # [N, K_CB]
        dist = cbn_ref[q:q + 1, :] - 2.0 * dots      # ||c||^2 - 2<r,c> (norms precomputed)
        # first-argmin along K.  Kept as two single-operand reductions because a
        # fused (value, index) reduce is not guaranteed to lower in Mosaic.
        min_val = jnp.min(dist, axis=-1, keepdims=True)                  # [N, 1]
        idx = jnp.min(jnp.where(dist == min_val, lane, k_cb),
                      axis=-1, keepdims=True)                            # [N, 1]
        cols.append(idx)
        onehot = (lane == idx).astype(jnp.float32)                       # [N, K_CB]
        r = r - jnp.dot(onehot, cb, preferred_element_type=jnp.float32)
    # Output is 512 bytes total at these shapes; a lane-dense [n_q, N] layout only
    # matters at real sizes (see TODO at top of file).
    codes_ref[...] = jnp.concatenate(cols, axis=1).astype(jnp.int32)


# ---------------- wrapper ----------------
def init_params(key):
    k1, k2, k3, k4, k5 = jax.random.split(key, 5)
    w1 = jax.random.normal(k1, (H1, C_IN, K1), jnp.float32) * 0.2   # torch conv layout
    b1 = jax.random.normal(k2, (H1,), jnp.float32) * 0.1
    w2 = jax.random.normal(k3, (D_LAT, H1, K2), jnp.float32) * 0.1
    b2 = jax.random.normal(k4, (D_LAT,), jnp.float32) * 0.1
    codebooks = jax.random.normal(k5, (N_Q, K_CB, D_LAT), jnp.float32)
    return {
        "w1": w1.reshape(H1, K1).T,             # [K1, H1]          (C_IN == 1)
        "b1": b1.reshape(1, H1),
        "w2": w2.transpose(2, 1, 0),            # [K2, H1, D_LAT]   (per-tap slices)
        "b2": b2.reshape(1, D_LAT),
        "codebooks": codebooks,                 # [N_Q, K_CB, D_LAT]
        "cb_norms": jnp.sum(codebooks * codebooks, axis=-1),   # [N_Q, K_CB], static
    }


def wrapped_encodec_forward(x, params):
    """Equivalent of WrappedEncodec.forward:
       frames = model.encode(x); return cat([f[0] for f in frames], dim=-1).

    Because kernel == stride and FRAME is a multiple of the hop, encoding the whole
    input in one pass is bit-identical to per-frame encode + concat, so the per-frame
    loop is folded into a single fused pallas_call.
    """
    Bx, C, Tx = x.shape                        # C == 1 (mono), NCW like torch
    n_rows = Bx * Tx // HOP                    # one code step per row
    x_rows = x.reshape(n_rows, HOP)            # pure contiguous reshape, no transpose

    codes_flat = pl.pallas_call(
        functools.partial(_encodec_fused_kernel, n_q=N_Q, k1=K1, hidden=H1),
        out_shape=jax.ShapeDtypeStruct((n_rows, N_Q), jnp.int32),
        in_specs=[_VMEM] * 7,
        out_specs=_VMEM,
    )(x_rows, params["w1"], params["b1"], params["w2"], params["b2"],
      params["codebooks"], params["cb_norms"])

    t_code = Tx // HOP
    return codes_flat.reshape(Bx, t_code, N_Q).transpose(0, 2, 1)   # [B, n_q, T']


if __name__ == "__main__":
    key = jax.random.PRNGKey(0)
    kx, kp = jax.random.split(key)
    x = jax.random.normal(kx, (B, C_IN, T), jnp.float32)   # NCW audio
    params = init_params(kp)

    codes = wrapped_encodec_forward(x, params)
    jax.block_until_ready(codes)

    expected_t = T // HOP     # 16 code steps total across both frames
    assert codes.shape == (B, N_Q, expected_t), codes.shape
    assert codes.dtype == jnp.int32
    print("KERNEL_OK")
</pallas_src>

<mosaic_0001>
module attributes {stable_mosaic.version = 11 : i64} {
  func.func @_encodec_fused_kernel(%arg0: memref<32x8xf32, #tpu.memory_space<vmem>>, %arg1: memref<4x16xf32, #tpu.memory_space<vmem>>, %arg2: memref<1x16xf32, #tpu.memory_space<vmem>>, %arg3: memref<2x16x32xf32, #tpu.memory_space<vmem>>, %arg4: memref<1x32xf32, #tpu.memory_space<vmem>>, %arg5: memref<4x64x32xf32, #tpu.memory_space<vmem>>, %arg6: memref<4x64xf32, #tpu.memory_space<vmem>>, %arg7: memref<32x4xi32, #tpu.memory_space<vmem>>) attributes {dimension_semantics = [], scalar_prefetch = 0 : i64, scratch_operands = 0 : i64, tpu.core_type = #tpu.core_type<tc>} {
    %c0 = arith.constant 0 : index
    %c0_0 = arith.constant 0 : index
    %0 = vector.load %arg0[%c0, %c0_0] : memref<32x8xf32, #tpu.memory_space<vmem>>, vector<32x8xf32>
    %c0_1 = arith.constant 0 : index
    %c0_2 = arith.constant 0 : index
    %1 = vector.load %arg2[%c0_1, %c0_2] : memref<1x16xf32, #tpu.memory_space<vmem>>, vector<1x16xf32>
    %2 = vector.extract_strided_slice %0 {offsets = [0, 0], sizes = [32, 1], strides = [1, 1]} : vector<32x8xf32> to vector<32x1xf32>
    %c0_3 = arith.constant 0 : index
    %c0_4 = arith.constant 0 : index
    %3 = vector.load %arg1[%c0_3, %c0_4] : memref<4x16xf32, #tpu.memory_space<vmem>>, vector<1x16xf32>
    %4 = vector.broadcast %2 : vector<32x1xf32> to vector<32x16xf32>
    %5 = vector.broadcast %3 : vector<1x16xf32> to vector<32x16xf32>
    %6 = arith.mulf %4, %5 : vector<32x16xf32>
    %7 = vector.broadcast %1 : vector<1x16xf32> to vector<32x16xf32>
    %8 = arith.addf %7, %6 : vector<32x16xf32>
    %9 = vector.extract_strided_slice %0 {offsets = [0, 1], sizes = [32, 1], strides = [1, 1]} : vector<32x8xf32> to vector<32x1xf32>
    %c1 = arith.constant 1 : index
    %c0_5 = arith.constant 0 : index
    %10 = vector.load %arg1[%c1, %c0_5] : memref<4x16xf32, #tpu.memory_space<vmem>>, vector<1x16xf32>
    %11 = vector.broadcast %9 : vector<32x1xf32> to vector<32x16xf32>
    %12 = vector.broadcast %10 : vector<1x16xf32> to vector<32x16xf32>
    %13 = arith.mulf %11, %12 : vector<32x16xf32>
    %14 = arith.addf %8, %13 : vector<32x16xf32>
    %15 = vector.extract_strided_slice %0 {offsets = [0, 2], sizes = [32, 1], strides = [1, 1]} : vector<32x8xf32> to vector<32x1xf32>
    %c2 = arith.constant 2 : index
    %c0_6 = arith.constant 0 : index
    %16 = vector.load %arg1[%c2, %c0_6] : memref<4x16xf32, #tpu.memory_space<vmem>>, vector<1x16xf32>
    %17 = vector.broadcast %15 : vector<32x1xf32> to vector<32x16xf32>
    %18 = vector.broadcast %16 : vector<1x16xf32> to vector<32x16xf32>
    %19 = arith.mulf %17, %18 : vector<32x16xf32>
    %20 = arith.addf %14, %19 : vector<32x16xf32>
    %21 = vector.extract_strided_slice %0 {offsets = [0, 3], sizes = [32, 1], strides = [1, 1]} : vector<32x8xf32> to vector<32x1xf32>
    %c3 = arith.constant 3 : index
    %c0_7 = arith.constant 0 : index
    %22 = vector.load %arg1[%c3, %c0_7] : memref<4x16xf32, #tpu.memory_space<vmem>>, vector<1x16xf32>
    %23 = vector.broadcast %21 : vector<32x1xf32> to vector<32x16xf32>
    %24 = vector.broadcast %22 : vector<1x16xf32> to vector<32x16xf32>
    %25 = arith.mulf %23, %24 : vector<32x16xf32>
    %26 = arith.addf %20, %25 : vector<32x16xf32>
    %cst = arith.constant 0.000000e+00 : f32
    %27 = vector.broadcast %cst : f32 to vector<32x16xf32>
    %28 = arith.cmpf ogt, %26, %27 : vector<32x16xf32>
    %29 = math.exp %26 : vector<32x16xf32>
    %cst_8 = arith.constant 1.000000e+00 : f32
    %30 = vector.broadcast %cst_8 : f32 to vector<32x16xf32>
    %31 = arith.subf %29, %30 : vector<32x16xf32>
    %32 = arith.select %28, %26, %31 : vector<32x16xi1>, vector<32x16xf32>
    %33 = vector.extract_strided_slice %0 {offsets = [0, 4], sizes = [32, 1], strides = [1, 1]} : vector<32x8xf32> to vector<32x1xf32>
    %c0_9 = arith.constant 0 : index
    %c0_10 = arith.constant 0 : index
    %34 = vector.load %arg1[%c0_9, %c0_10] : memref<4x16xf32, #tpu.memory_space<vmem>>, vector<1x16xf32>
    %35 = vector.broadcast %33 : vector<32x1xf32> to vector<32x16xf32>
    %36 = vector.broadcast %34 : vector<1x16xf32> to vector<32x16xf32>
    %37 = arith.mulf %35, %36 : vector<32x16xf32>
    %38 = vector.broadcast %1 : vector<1x16xf32> to vector<32x16xf32>
    %39 = arith.addf %38, %37 : vector<32x16xf32>
    %40 = vector.extract_strided_slice %0 {offsets = [0, 5], sizes = [32, 1], strides = [1, 1]} : vector<32x8xf32> to vector<32x1xf32>
    %c1_11 = arith.constant 1 : index
    %c0_12 = arith.constant 0 : index
    %41 = vector.load %arg1[%c1_11, %c0_12] : memref<4x16xf32, #tpu.memory_space<vmem>>, vector<1x16xf32>
    %42 = vector.broadcast %40 : vector<32x1xf32> to vector<32x16xf32>
    %43 = vector.broadcast %41 : vector<1x16xf32> to vector<32x16xf32>
    %44 = arith.mulf %42, %43 : vector<32x16xf32>
    %45 = arith.addf %39, %44 : vector<32x16xf32>
    %46 = vector.extract_strided_slice %0 {offsets = [0, 6], sizes = [32, 1], strides = [1, 1]} : vector<32x8xf32> to vector<32x1xf32>
    %c2_13 = arith.constant 2 : index
    %c0_14 = arith.constant 0 : index
    %47 = vector.load %arg1[%c2_13, %c0_14] : memref<4x16xf32, #tpu.memory_space<vmem>>, vector<1x16xf32>
    %48 = vector.broadcast %46 : vector<32x1xf32> to vector<32x16xf32>
    %49 = vector.broadcast %47 : vector<1x16xf32> to vector<32x16xf32>
    %50 = arith.mulf %48, %49 : vector<32x16xf32>
    %51 = arith.addf %45, %50 : vector<32x16xf32>
    %52 = vector.extract_strided_slice %0 {offsets = [0, 7], sizes = [32, 1], strides = [1, 1]} : vector<32x8xf32> to vector<32x1xf32>
    %c3_15 = arith.constant 3 : index
    %c0_16 = arith.constant 0 : index
    %53 = vector.load %arg1[%c3_15, %c0_16] : memref<4x16xf32, #tpu.memory_space<vmem>>, vector<1x16xf32>
    %54 = vector.broadcast %52 : vector<32x1xf32> to vector<32x16xf32>
    %55 = vector.broadcast %53 : vector<1x16xf32> to vector<32x16xf32>
    %56 = arith.mulf %54, %55 : vector<32x16xf32>
    %57 = arith.addf %51, %56 : vector<32x16xf32>
    %cst_17 = arith.constant 0.000000e+00 : f32
    %58 = vector.broadcast %cst_17 : f32 to vector<32x16xf32>
    %59 = arith.cmpf ogt, %57, %58 : vector<32x16xf32>
    %60 = math.exp %57 : vector<32x16xf32>
    %cst_18 = arith.constant 1.000000e+00 : f32
    %61 = vector.broadcast %cst_18 : f32 to vector<32x16xf32>
    %62 = arith.subf %60, %61 : vector<32x16xf32>
    %63 = arith.select %59, %57, %62 : vector<32x16xi1>, vector<32x16xf32>
    %c0_19 = arith.constant 0 : index
    %c0_20 = arith.constant 0 : index
    %64 = vector.load %arg4[%c0_19, %c0_20] : memref<1x32xf32, #tpu.memory_space<vmem>>, vector<1x32xf32>
    %c0_21 = arith.constant 0 : index
    %c0_22 = arith.constant 0 : index
    %c0_23 = arith.constant 0 : index
    %65 = vector.load %arg3[%c0_21, %c0_22, %c0_23] : memref<2x16x32xf32, #tpu.memory_space<vmem>>, vector<1x16x32xf32>
    %66 = vector.shape_cast %65 : vector<1x16x32xf32> to vector<16x32xf32>
    %cst_24 = arith.constant dense<0.000000e+00> : vector<32x32xf32>
    %67 = tpu.matmul %32, %66, %cst_24 {dimension_numbers = #tpu.dot_dimension_numbers<[1], [0], [0], [1], [0, 0, 1, 1], [], []>} : vector<32x16xf32>, vector<16x32xf32>, vector<32x32xf32> -> vector<32x32xf32>
    %68 = vector.broadcast %64 : vector<1x32xf32> to vector<32x32xf32>
    %69 = arith.addf %68, %67 : vector<32x32xf32>
    %c1_25 = arith.constant 1 : index
    %c0_26 = arith.constant 0 : index
    %c0_27 = arith.constant 0 : index
    %70 = vector.load %arg3[%c1_25, %c0_26, %c0_27] : memref<2x16x32xf32, #tpu.memory_space<vmem>>, vector<1x16x32xf32>
    %71 = vector.shape_cast %70 : vector<1x16x32xf32> to vector<16x32xf32>
    %cst_28 = arith.constant dense<0.000000e+00> : vector<32x32xf32>
    %72 = tpu.matmul %63, %71, %cst_28 {dimension_numbers = #tpu.dot_dimension_numbers<[1], [0], [0], [1], [0, 0, 1, 1], [], []>} : vector<32x16xf32>, vector<16x32xf32>, vector<32x32xf32> -> vector<32x32xf32>
    %73 = arith.addf %69, %72 : vector<32x32xf32>
    %74 = tpu.iota {dimensions = array<i32: 1>} : vector<32x64xi32>
    %c0_29 = arith.constant 0 : index
    %c0_30 = arith.constant 0 : index
    %c0_31 = arith.constant 0 : index
    %75 = vector.load %arg5[%c0_29, %c0_30, %c0_31] : memref<4x64x32xf32, #tpu.memory_space<vmem>>, vector<1x64x32xf32>
    %76 = vector.shape_cast %75 : vector<1x64x32xf32> to vector<64x32xf32>
    %cst_32 = arith.constant dense<0.000000e+00> : vector<32x64xf32>
    %77 = tpu.matmul %73, %76, %cst_32 {dimension_numbers = #tpu.dot_dimension_numbers<[1], [1], [0], [0], [0, 0, 1, 0], [], []>} : vector<32x32xf32>, vector<64x32xf32>, vector<32x64xf32> -> vector<32x64xf32>
    %c0_33 = arith.constant 0 : index
    %c0_34 = arith.constant 0 : index
    %78 = vector.load %arg6[%c0_33, %c0_34] : memref<4x64xf32, #tpu.memory_space<vmem>>, vector<1x64xf32>
    %cst_35 = arith.constant 2.000000e+00 : f32
    %79 = vector.broadcast %cst_35 : f32 to vector<32x64xf32>
    %80 = arith.mulf %79, %77 : vector<32x64xf32>
    %81 = vector.broadcast %78 : vector<1x64xf32> to vector<32x64xf32>
    %82 = arith.subf %81, %80 : vector<32x64xf32>
    %cst_36 = arith.constant dense<0x7F800000> : vector<32xf32>
    %83 = vector.multi_reduction <minimumf>, %82, %cst_36 [1] : vector<32x64xf32> to vector<32xf32>
    %84 = vector.shape_cast %83 : vector<32xf32> to vector<32x1xf32>
    %85 = vector.broadcast %84 : vector<32x1xf32> to vector<32x64xf32>
    %86 = arith.cmpf oeq, %82, %85 : vector<32x64xf32>
    %c64_i32 = arith.constant 64 : i32
    %87 = vector.broadcast %c64_i32 : i32 to vector<32x64xi32>
    %88 = arith.select %86, %74, %87 : vector<32x64xi1>, vector<32x64xi32>
    %cst_37 = arith.constant dense<2147483647> : vector<32xi32>
    %89 = vector.multi_reduction <minsi>, %88, %cst_37 [1] : vector<32x64xi32> to vector<32xi32>
    %90 = vector.shape_cast %89 : vector<32xi32> to vector<32x1xi32>
    %91 = vector.broadcast %90 : vector<32x1xi32> to vector<32x64xi32>
    %92 = arith.cmpi eq, %74, %91 : vector<32x64xi32>
    %93 = arith.extui %92 : vector<32x64xi1> to vector<32x64xi32>
    %94 = arith.sitofp %93 : vector<32x64xi32> to vector<32x64xf32>
    %cst_38 = arith.constant dense<0.000000e+00> : vector<32x32xf32>
    %95 = tpu.matmul %94, %76, %cst_38 {dimension_numbers = #tpu.dot_dimension_numbers<[1], [0], [0], [1], [0, 0, 1, 1], [], []>} : vector<32x64xf32>, vector<64x32xf32>, vector<32x32xf32> -> vector<32x32xf32>
    %96 = arith.subf %73, %95 : vector<32x32xf32>
    %c1_39 = arith.constant 1 : index
    %c0_40 = arith.constant 0 : index
    %c0_41 = arith.constant 0 : index
    %97 = vector.load %arg5[%c1_39, %c0_40, %c0_41] : memref<4x64x32xf32, #tpu.memory_space<vmem>>, vector<1x64x32xf32>
    %98 = vector.shape_cast %97 : vector<1x64x32xf32> to vector<64x32xf32>
    %cst_42 = arith.constant dense<0.000000e+00> : vector<32x64xf32>
    %99 = tpu.matmul %96, %98, %cst_42 {dimension_numbers = #tpu.dot_dimension_numbers<[1], [1], [0], [0], [0, 0, 1, 0], [], []>} : vector<32x32xf32>, vector<64x32xf32>, vector<32x64xf32> -> vector<32x64xf32>
    %c1_43 = arith.constant 1 : index
    %c0_44 = arith.constant 0 : index
    %100 = vector.load %arg6[%c1_43, %c0_44] : memref<4x64xf32, #tpu.memory_space<vmem>>, vector<1x64xf32>
    %cst_45 = arith.constant 2.000000e+00 : f32
    %101 = vector.broadcast %cst_45 : f32 to vector<32x64xf32>
    %102 = arith.mulf %101, %99 : vector<32x64xf32>
    %103 = vector.broadcast %100 : vector<1x64xf32> to vector<32x64xf32>
    %104 = arith.subf %103, %102 : vector<32x64xf32>
    %cst_46 = arith.constant dense<0x7F800000> : vector<32xf32>
    %105 = vector.multi_reduction <minimumf>, %104, %cst_46 [1] : vector<32x64xf32> to vector<32xf32>
    %106 = vector.shape_cast %105 : vector<32xf32> to vector<32x1xf32>
    %107 = vector.broadcast %106 : vector<32x1xf32> to vector<32x64xf32>
    %108 = arith.cmpf oeq, %104, %107 : vector<32x64xf32>
    %c64_i32_47 = arith.constant 64 : i32
    %109 = vector.broadcast %c64_i32_47 : i32 to vector<32x64xi32>
    %110 = arith.select %108, %74, %109 : vector<32x64xi1>, vector<32x64xi32>
    %cst_48 = arith.constant dense<2147483647> : vector<32xi32>
    %111 = vector.multi_reduction <minsi>, %110, %cst_48 [1] : vector<32x64xi32> to vector<32xi32>
    %112 = vector.shape_cast %111 : vector<32xi32> to vector<32x1xi32>
    %113 = vector.broadcast %112 : vector<32x1xi32> to vector<32x64xi32>
    %114 = arith.cmpi eq, %74, %113 : vector<32x64xi32>
    %115 = arith.extui %114 : vector<32x64xi1> to vector<32x64xi32>
    %116 = arith.sitofp %115 : vector<32x64xi32> to vector<32x64xf32>
    %cst_49 = arith.constant dense<0.000000e+00> : vector<32x32xf32>
    %117 = tpu.matmul %116, %98, %cst_49 {dimension_numbers = #tpu.dot_dimension_numbers<[1], [0], [0], [1], [0, 0, 1, 1], [], []>} : vector<32x64xf32>, vector<64x32xf32>, vector<32x32xf32> -> vector<32x32xf32>
    %118 = arith.subf %96, %117 : vector<32x32xf32>
    %c2_50 = arith.constant 2 : index
    %c0_51 = arith.constant 0 : index
    %c0_52 = arith.constant 0 : index
    %119 = vector.load %arg5[%c2_50, %c0_51, %c0_52] : memref<4x64x32xf32, #tpu.memory_space<vmem>>, vector<1x64x32xf32>
    %120 = vector.shape_cast %119 : vector<1x64x32xf32> to vector<64x32xf32>
    %cst_53 = arith.constant dense<0.000000e+00> : vector<32x64xf32>
    %121 = tpu.matmul %118, %120, %cst_53 {dimension_numbers = #tpu.dot_dimension_numbers<[1], [1], [0], [0], [0, 0, 1, 0], [], []>} : vector<32x32xf32>, vector<64x32xf32>, vector<32x64xf32> -> vector<32x64xf32>
    %c2_54 = arith.constant 2 : index
    %c0_55 = arith.constant 0 : index
    %122 = vector.load %arg6[%c2_54, %c0_55] : memref<4x64xf32, #tpu.memory_space<vmem>>, vector<1x64xf32>
    %cst_56 = arith.constant 2.000000e+00 : f32
    %123 = vector.broadcast %cst_56 : f32 to vector<32x64xf32>
    %124 = arith.mulf %123, %121 : vector<32x64xf32>
    %125 = vector.broadcast %122 : vector<1x64xf32> to vector<32x64xf32>
    %126 = arith.subf %125, %124 : vector<32x64xf32>
    %cst_57 = arith.constant dense<0x7F800000> : vector<32xf32>
    %127 = vector.multi_reduction <minimumf>, %126, %cst_57 [1] : vector<32x64xf32> to vector<32xf32>
    %128 = vector.shape_cast %127 : vector<32xf32> to vector<32x1xf32>
    %129 = vector.broadcast %128 : vector<32x1xf32> to vector<32x64xf32>
    %130 = arith.cmpf oeq, %126, %129 : vector<32x64xf32>
    %c64_i32_58 = arith.constant 64 : i32
    %131 = vector.broadcast %c64_i32_58 : i32 to vector<32x64xi32>
    %132 = arith.select %130, %74, %131 : vector<32x64xi1>, vector<32x64xi32>
    %cst_59 = arith.constant dense<2147483647> : vector<32xi32>
    %133 = vector.multi_reduction <minsi>, %132, %cst_59 [1] : vector<32x64xi32> to vector<32xi32>
    %134 = vector.shape_cast %133 : vector<32xi32> to vector<32x1xi32>
    %135 = vector.broadcast %134 : vector<32x1xi32> to vector<32x64xi32>
    %136 = arith.cmpi eq, %74, %135 : vector<32x64xi32>
    %137 = arith.extui %136 : vector<32x64xi1> to vector<32x64xi32>
    %138 = arith.sitofp %137 : vector<32x64xi32> to vector<32x64xf32>
    %cst_60 = arith.constant dense<0.000000e+00> : vector<32x32xf32>
    %139 = tpu.matmul %138, %120, %cst_60 {dimension_numbers = #tpu.dot_dimension_numbers<[1], [0], [0], [1], [0, 0, 1, 1], [], []>} : vector<32x64xf32>, vector<64x32xf32>, vector<32x32xf32> -> vector<32x32xf32>
    %140 = arith.subf %118, %139 : vector<32x32xf32>
    %c3_61 = arith.constant 3 : index
    %c0_62 = arith.constant 0 : index
    %c0_63 = arith.constant 0 : index
    %141 = vector.load %arg5[%c3_61, %c0_62, %c0_63] : memref<4x64x32xf32, #tpu.memory_space<vmem>>, vector<1x64x32xf32>
    %142 = vector.shape_cast %141 : vector<1x64x32xf32> to vector<64x32xf32>
    %cst_64 = arith.constant dense<0.000000e+00> : vector<32x64xf32>
    %143 = tpu.matmul %140, %142, %cst_64 {dimension_numbers = #tpu.dot_dimension_numbers<[1], [1], [0], [0], [0, 0, 1, 0], [], []>} : vector<32x32xf32>, vector<64x32xf32>, vector<32x64xf32> -> vector<32x64xf32>
    %c3_65 = arith.constant 3 : index
    %c0_66 = arith.constant 0 : index
    %144 = vector.load %arg6[%c3_65, %c0_66] : memref<4x64xf32, #tpu.memory_space<vmem>>, vector<1x64xf32>
    %cst_67 = arith.constant 2.000000e+00 : f32
    %145 = vector.broadcast %cst_67 : f32 to vector<32x64xf32>
    %146 = arith.mulf %145, %143 : vector<32x64xf32>
    %147 = vector.broadcast %144 : vector<1x64xf32> to vector<32x64xf32>
    %148 = arith.subf %147, %146 : vector<32x64xf32>
    %cst_68 = arith.constant dense<0x7F800000> : vector<32xf32>
    %149 = vector.multi_reduction <minimumf>, %148, %cst_68 [1] : vector<32x64xf32> to vector<32xf32>
    %150 = vector.shape_cast %149 : vector<32xf32> to vector<32x1xf32>
    %151 = vector.broadcast %150 : vector<32x1xf32> to vector<32x64xf32>
    %152 = arith.cmpf oeq, %148, %151 : vector<32x64xf32>
    %c64_i32_69 = arith.constant 64 : i32
    %153 = vector.broadcast %c64_i32_69 : i32 to vector<32x64xi32>
    %154 = arith.select %152, %74, %153 : vector<32x64xi1>, vector<32x64xi32>
    %cst_70 = arith.constant dense<2147483647> : vector<32xi32>
    %155 = vector.multi_reduction <minsi>, %154, %cst_70 [1] : vector<32x64xi32> to vector<32xi32>
    %156 = vector.shape_cast %155 : vector<32xi32> to vector<32x1xi32>
    %157 = tpu.concatenate %90, %112, %134, %156 in 1 : vector<32x1xi32>, vector<32x1xi32>, vector<32x1xi32>, vector<32x1xi32> -> vector<32x4xi32>
    %c0_71 = arith.constant 0 : index
    %c0_72 = arith.constant 0 : index
    %158 = vector.load %arg7[%c0_71, %c0_72] : memref<32x4xi32, #tpu.memory_space<vmem>>, vector<32x4xi32>
    tpu.vector_store %arg7[%c0_71, %c0_72], %157 {strides = array<i32>} : memref<32x4xi32, #tpu.memory_space<vmem>>, vector<32x4xi32>,
    return
  }
}

</mosaic_0001>

<bundles_post_ra>
// kernel: tpu_custom_call.1
= control target key start
LH: loop header
LB: loop body
LE: loop exit
PB: predicated region body
PF: predicated region fallthrough
CT: control target
= control target key end

     0   :  { %v2367_v0 = vmov 1   ;;  %v2368_v1 = vmov 0   ;;  %v2369_v5 = vmov 2   ;;  %v2370_v7 = vmov 3   ;;  %s2947_s0 = inlined_call_operand.vmem [shape: f32[32,8], index: 0, kind: input, shape index: {}]   ;;  %s2948_s3 = inlined_call_operand.vmem [shape: f32[2,16,32], index: 3, kind: input, shape index: {}]   ;;  %s2949_s5 = inlined_call_operand.vmem [shape: f32[4,64,32], index: 5, kind: input, shape index: {}]   ;;  %s2950_s1 = inlined_call_operand.vmem [shape: f32[4,16], index: 1, kind: input, shape index: {}]   ;;  %s2951_s2 = inlined_call_operand.vmem [shape: f32[1,16], index: 2, kind: input, shape index: {}]   ;;  %s2952_s4 = inlined_call_operand.vmem [shape: f32[1,32], index: 4, kind: input, shape index: {}]   ;;  %s2953_s6 = inlined_call_operand.vmem [shape: f32[4,64], index: 6, kind: input, shape index: {}]   ;;  %s2954_s7 = inlined_call_operand.vmem [shape: s32[32,4], index: 7, kind: output, shape index: {}]  }
   0x1   :  { %2330 = vset.pattern.permute.xlu1 %v2367_v0  ;;  %2329 = vset.pattern.permute.xlu0 %v2368_v1  ;;  %v26_v2 = vld [vmem:[%s2947_s0] sm:$0xff]  ;;  %v27_v3 = vld [vmem:[%s2947_s0 + $0x8] sm:$0xff]  ;;  %v28_v4 = vld [vmem:[%s2947_s0 + $0x10] sm:$0xff]  ;;  %v2371_v8 = vmov 4   ;;  %v2372_v11 = vmov 5   ;;  %v2373_v13 = vmov 6  }
   0x2   :  { %72 = vperm.xlu1 %2330, %v26_v2   ;;  %34 = vperm.xlu0 %2329, %v26_v2   ;;  %v29_v6 = vld [vmem:[%s2947_s0 + $0x18] sm:$0xff]  ;;  %v294_v9 = vld [vmem:[%s2948_s3] sm:$0xff]  ;;  %v295_v10 = vld [vmem:[%s2948_s3 + $0x8] sm:$0xff]  ;;  %v2374_v14 = vmov 7   ;;  %vm518_vm0 = vcmask 261120   ;;  %vm296_vm2 = vcmask 130048  }
   0x3   :  { %v2160_v12 = vpack.c.bf16 %v295_v10, %v294_v9  ;;  %v1784_v15 = vld [vmem:[%s2948_s3 + $0x10] sm:$0xff]  ;;  %v1785_v16 = vld [vmem:[%s2948_s3 + $0x18] sm:$0xff]  ;;  %v510_v18 = vld [vmem:[%s2949_s5] sm:$0xff]  ;;  %vm653_vm11 = vcmask 523264  }
   0x4   :  { %v2440_v17 = vpack.c.bf16 %v1785_v16, %v1784_v15  ;;  %v511_v19 = vld [vmem:[%s2949_s5 + $0x8] sm:$0xff]  ;;  %vm2451_vm1 = vmpackc.low %vm518_vm0, %vm518_vm0  ;;  %v512_v22 = vld [vmem:[%s2949_s5 + $0x10] sm:$0xff] }
   0x5   :  { %2161 = vmatprep.subr.bf16.mxu0 %v2160_v12  ;;  %v2455_v21 = vpack.c.bf16 %v511_v19, %v510_v18  ;;  %v513_v23 = vld [vmem:[%s2949_s5 + $0x18] sm:$0xff]  ;;  %v514_v25 = vld [vmem:[%s2949_s5 + $0x20] sm:$0xff]  ;;  %v515_v26 = vld [vmem:[%s2949_s5 + $0x28] sm:$0xff] }
   0x6   :  { %76 = vperm.xlu1 %2330, %v27_v3   ;;  %39 = vperm.xlu0 %2329, %v27_v3   ;;  %v2463_v24 = vpack.c.bf16 %v513_v23, %v512_v22  ;;  %v2480_v27 = vpack.c.bf16 %v515_v26, %v514_v25  ;;  %v516_v28 = vld [vmem:[%s2949_s5 + $0x30] sm:$0xff]  ;;  %v517_v29 = vld [vmem:[%s2949_s5 + $0x38] sm:$0xff]  ;;  %v2505_v35 = vld [vmem:[%s2950_s1] ss:$0 sm:$0xff] }
   0x7   :  { %2163 = vmatpush3.bf16.msra.mxu0 %v2160_v12  ;;  %2170 = vmatprep.subr.msk.bf16.mxu1 %vm2451_vm1, %v2455_v21  ;;  %v2494_v32 = vpack.c.bf16 %v517_v29, %v516_v28  ;;  %v2511_v39 = vld [vmem:[%s2951_s2] ss:$0 sm:$0xff]  ;;  %v2519_v40 = vld [vmem:[%s2950_s1 + $0x1] ss:$0 sm:$0xff]  ;;  %v2524_v41 = vld [vmem:[%s2950_s1 + $0x2] ss:$0 sm:$0xff] }
   0x8   :  { %2165 = vmatprep.subr.bf16.mxu0 %v2440_v17  ;;  %2173 = vmatpush3.bf16.xpose.msk.msra.mxu1 %vm2451_vm1, %v2455_v21  ;;  %v2534_v48 = vld [vmem:[%s2950_s1 + $0x3] ss:$0 sm:$0xff] }
   0x9   :  { %2176 = vmatprep.subr.msk.bf16.mxu1 %vm2451_vm1, %v2463_v24 }
   0xa   :  { %2331 = vset.pattern.permute.xlu1 %v2369_v5  ;;  %44 = vperm.xlu0 %2329, %v28_v4  }
   0xb   :  { %101 = vperm.xlu1 %2331, %v26_v2  }
   0xe   :  { %49 = vperm.xlu0 %2329, %v29_v6  }
   0xf   :  { %105 = vperm.xlu1 %2331, %v27_v3  }
  0x10   :  { %2179 = vmatpush3.bf16.xpose.msk.msra.mxu1 %vm2451_vm1, %v2463_v24 }
  0x11   :  { %2182 = vmatprep.subr.msk.bf16.mxu1 %vm2451_vm1, %v2480_v27 }
  0x12   :  { %2332 = vset.pattern.permute.xlu0 %v2367_v0 }
  0x13   :  { %2333 = vset.pattern.permute.xlu1 %v2370_v7  ;;  %80 = vperm.xlu0 %2332, %v28_v4  }
  0x14   :  { %130 = vperm.xlu1 %2333, %v26_v2  }
  0x17   :  { %2335 = vset.pattern.permute.xlu0 %v2370_v7 }
  0x18   :  { %2334 = vset.pattern.permute.xlu1 %v2367_v0  ;;  %134 = vperm.xlu0 %2335, %v27_v3  }
  0x19   :  { %84 = vperm.xlu1 %2334, %v29_v6   ;;  %2185 = vmatpush3.bf16.xpose.msk.msra.mxu1 %vm2451_vm1, %v2480_v27 }
  0x1a   :  { %2188 = vmatprep.subr.msk.bf16.mxu1 %vm2451_vm1, %v2494_v32 }
  0x1c   :  { %2338 = vset.pattern.permute.xlu0 %v2369_v5 }
  0x1d   :  { %2336 = vset.pattern.permute.xlu1 %v2369_v5  ;;  %113 = vperm.xlu0 %2338, %v29_v6  }
  0x1e   :  { %109 = vperm.xlu1 %2336, %v28_v4  }
  0x21   :  { %2341 = vset.pattern.permute.xlu0 %v2371_v8  ;;  %2191 = vmatpush3.bf16.xpose.msk.msra.mxu1 %vm2451_vm1, %v2494_v32 }
  0x22   :  { %2337 = vset.pattern.permute.xlu1 %v2371_v8  ;;  %186 = vperm.xlu0 %2341, %v28_v4  }
  0x23   :  { %178 = vperm.xlu1 %2337, %v26_v2   ;;  %2193 = vmatprep.subr.bf16.mxu1 %v2455_v21 }
  0x26   :  { %2342 = vset.pattern.permute.xlu0 %v2372_v11 }
  0x27   :  { %182 = vperm.xlu1 %2337, %v27_v3   ;;  %202 = vperm.xlu0 %2342, %v26_v2  }
  0x2b   :  { %2339 = vset.pattern.permute.xlu1 %v2370_v7  ;;  %214 = vperm.xlu0 %2342, %v29_v6  }
  0x2c   :  { %138 = vperm.xlu1 %2339, %v28_v4  }
  0x2f   :  { %2347 = vset.pattern.permute.xlu0 %v2373_v13 }
  0x30   :  { %142 = vperm.xlu1 %2339, %v29_v6   ;;  %230 = vperm.xlu0 %2347, %v27_v3  }
  0x34   :  { %2340 = vset.pattern.permute.xlu1 %v2372_v11  ;;  %238 = vperm.xlu0 %2347, %v29_v6  }
  0x35   :  { %206 = vperm.xlu1 %2340, %v27_v3  }
  0x38   :  { %2350 = vset.pattern.permute.xlu0 %v2374_v14 }
  0x39   :  { %2343 = vset.pattern.permute.xlu1 %v2373_v13 }
  0x3a   :  { %226 = vperm.xlu1 %2343, %v26_v2  }
  0x3e   :  { %2344 = vset.pattern.permute.xlu1 %v2371_v8 }
  0x3f   :  { %190 = vperm.xlu1 %2344, %v29_v6  }
  0x43   :  { %2345 = vset.pattern.permute.xlu1 %v2372_v11 }
  0x44   :  { %210 = vperm.xlu1 %2345, %v28_v4  }
  0x48   :  { %2346 = vset.pattern.permute.xlu1 %v2374_v14 }
  0x49   :  { %250 = vperm.xlu1 %2346, %v26_v2  }
  0x4d   :  { %254 = vperm.xlu1 %2346, %v27_v3  }
  0x51   :  { %2348 = vset.pattern.permute.xlu1 %v2373_v13 }
  0x52   :  { %234 = vperm.xlu1 %2348, %v28_v4  }
  0x56   :  { %2349 = vset.pattern.permute.xlu1 %v2374_v14 }
  0x57   :  { %258 = vperm.xlu1 %2349, %v28_v4  }
  0x5b   :  { %262 = vperm.xlu1 %2349, %v29_v6  }
  0x81   :  { %v73_v30 = vpop.permute.xlu1 %72  ;;  %v35_v31 = vpop.permute.xlu0 %34 }
  0x82   :  { %v56_v37 = vmul.f32 %v2505_v35, %v35_v31  ;;  %v91_v46 = vmul.f32 %v2519_v40, %v73_v30 }
  0x84   :  { %v66_v43 = vadd.f32 %v2511_v39, %v56_v37 }
  0x85   :  { %v77_v33 = vpop.permute.xlu1 %76  ;;  %v40_v34 = vpop.permute.xlu0 %39 }
  0x86   :  { %v57_v44 = vmul.f32 %v2505_v35, %v40_v34  ;;  %v95_v50 = vadd.f32 %v91_v46, %v66_v43  ;;  %v92_v53 = vmul.f32 %v2519_v40, %v77_v33 }
  0x88   :  { %v67_v49 = vadd.f32 %v2511_v39, %v57_v44 }
  0x89   :  { %v45_v36 = vpop.permute.xlu0 %44 }
  0x8a   :  { %v102_v38 = vpop.permute.xlu1 %101  ;;  %v96_v57 = vadd.f32 %v92_v53, %v67_v49  ;;  %v58_v4 = vmul.f32 %v2505_v35, %v45_v36 }
  0x8b   :  { %v120_v47 = vmul.f32 %v2524_v41, %v102_v38 }
  0x8c   :  { %v68_v9 = vadd.f32 %v2511_v39, %v58_v4 }
  0x8d   :  { %v50_v42 = vpop.permute.xlu0 %49  ;;  %v124_v54 = vadd.f32 %v120_v47, %v95_v50 }
  0x8e   :  { %v106_v45 = vpop.permute.xlu1 %105  ;;  %v59_v13 = vmul.f32 %v2505_v35, %v50_v42 }
  0x8f   :  { %v121_v55 = vmul.f32 %v2524_v41, %v106_v45 }
  0x90   :  { %v69_v23 = vadd.f32 %v2511_v39, %v59_v13 }
  0x91   :  { %v125_v60 = vadd.f32 %v121_v55, %v96_v57 }
  0x92   :  { %v81_v51 = vpop.permute.xlu0 %80 }
  0x93   :  { %v131_v52 = vpop.permute.xlu1 %130  ;;  %v93_v10 = vmul.f32 %v2519_v40, %v81_v51 }
  0x94   :  { %v149_v56 = vmul.f32 %v2534_v48, %v131_v52 }
  0x95   :  { %v97_v18 = vadd.f32 %v93_v10, %v68_v9 }
  0x96   :  { %v153_v58 = vadd.f32 %v149_v56, %v124_v54 }
  0x97   :  { %v135_v59 = vpop.permute.xlu0 %134 }
  0x98   :  { %v161_v61 = vmul.f32 1.442695, %v153_v58  ;;  %v150_v62 = vmul.f32 %v2534_v48, %v135_v59  ;;  %v85_v63 = vpop.permute.xlu1 %84  ;;  %vm157_vm3 = vcmp.gt.f32.partialorder %v153_v58, 0.0 }
  0x99   :  { %v94_v25 = vmul.f32 %v2519_v40, %v85_v63 }
  0x9a   :  { %2351 = vpow2.f32 %v161_v61  ;;  %v154_v0 = vadd.f32 %v150_v62, %v125_v60 }
  0x9b   :  { %v98_v33 = vadd.f32 %v94_v25, %v69_v23 }
  0x9c   :  { %v163_v1 = vmul.f32 1.442695, %v154_v0  ;;  %v114_v2 = vpop.permute.xlu0 %113  ;;  %vm158_vm4 = vcmp.gt.f32.partialorder %v154_v0, 0.0 }
  0x9d   :  { %v110_v3 = vpop.permute.xlu1 %109  ;;  %v123_v29 = vmul.f32 %v2524_v41, %v114_v2 }
  0x9e   :  { %2353 = vpow2.f32 %v163_v1  ;;  %v122_v19 = vmul.f32 %v2524_v41, %v110_v3 }
  0x9f   :  { %v127_v37 = vadd.f32 %v123_v29, %v98_v33 }
  0xa0   :  { %v126_v30 = vadd.f32 %v122_v19, %v97_v18 }
  0xa1   :  { %v187_v5 = vpop.permute.xlu0 %186 }
  0xa2   :  { %v179_v6 = vpop.permute.xlu1 %178  ;;  %v195_v7 = vmul.f32 %v2505_v35, %v187_v5 }
  0xa3   :  { %v193_v55 = vmul.f32 %v2505_v35, %v179_v6 }
  0xa4   :  { %v2352_v8 = vpop.eup %2351  ;;  %v2546_v11 = vadd.f32 %v2511_v39, %v195_v7 }
  0xa5   :  { %v1771_v12 = vadd.f32 -1.0, %v2352_v8  ;;  %v197_v62 = vadd.f32 %v2511_v39, %v193_v55 }
  0xa6   :  { %v183_v14 = vpop.permute.xlu1 %182  ;;  %v203_v49 = vpop.permute.xlu0 %202 }
  0xa7   :  { %v173_v15 = vsel %vm157_vm3, %v153_v58, %v1771_v12  ;;  %v194_v58 = vmul.f32 %v2505_v35, %v183_v14  ;;  %v217_v59 = vmul.f32 %v2519_v40, %v203_v49 }
  0xa8   :  { %v2354_v16 = vpop.eup %2353  ;;  %1990 = vmatprep.mubr.msk.f32.mxu0 %vm296_vm2, %v173_v15 }
  0xa9   :  { %v1772_v22 = vadd.f32 -1.0, %v2354_v16  ;;  %v198_v2 = vadd.f32 %v2511_v39, %v194_v58  ;;  %v221_v3 = vadd.f32 %v217_v59, %v197_v62 }
  0xaa   :  { %v215_v54 = vpop.permute.xlu0 %214 }
  0xab   :  { %v139_v26 = vpop.permute.xlu1 %138  ;;  %v174_v28 = vsel %vm158_vm4, %v154_v0, %v1772_v22  ;;  %v220_v18 = vmul.f32 %v2519_v40, %v215_v54 }
  0xac   :  { %v151_v31 = vmul.f32 %v2534_v48, %v139_v26  ;;  %1991 = vmatmul.mubr.msk.f32.vlgmr.msra.gmra.mrb[0].mxu0 %vm296_vm2, %v174_v28 }
  0xad   :  { %2167 = vmatpush3.bf16.msra.mxu0 %v2440_v17 }
  0xae   :  { %v155_v34 = vadd.f32 %v151_v31, %v126_v30 }
  0xaf   :  { %v143_v36 = vpop.permute.xlu1 %142  ;;  %v231_v1 = vpop.permute.xlu0 %230 }
  0xb0   :  { %v165_v38 = vmul.f32 1.442695, %v155_v34  ;;  %v152_v42 = vmul.f32 %v2534_v48, %v143_v36  ;;  %vm159_vm5 = vcmp.gt.f32.partialorder %v155_v34, 0.0 }
  0xb2   :  { %2355 = vpow2.f32 %v165_v38  ;;  %v156_v43 = vadd.f32 %v152_v42, %v127_v37 }
  0xb3   :  { %v239_v22 = vpop.permute.xlu0 %238 }
  0xb4   :  { %v167_v44 = vmul.f32 1.442695, %v156_v43  ;;  %v207_v45 = vpop.permute.xlu1 %206  ;;  %vm160_vm6 = vcmp.gt.f32.partialorder %v156_v43, 0.0  ;;  %v244_v28 = vmul.f32 %v2524_v41, %v239_v22 }
  0xb5   :  { %v218_v63 = vmul.f32 %v2519_v40, %v207_v45 }
  0xb6   :  { %2357 = vpow2.f32 %v167_v44 }
  0xb7   :  { %v222_v5 = vadd.f32 %v218_v63, %v198_v2 }
  0xb9   :  { %v227_v46 = vpop.permute.xlu1 %226 }
  0xba   :  { %v241_v0 = vmul.f32 %v2524_v41, %v227_v46 }
  0xbc   :  { %v2356_v47 = vpop.eup %2355  ;;  %v245_v6 = vadd.f32 %v241_v0, %v221_v3 }
  0xbd   :  { %v1773_v50 = vadd.f32 -1.0, %v2356_v47 }
  0xbe   :  { %v191_v51 = vpop.permute.xlu1 %190 }
  0xbf   :  { %v196_v17 = vmul.f32 %v2505_v35, %v191_v51  ;;  %v175_v52 = vsel %vm159_vm5, %v155_v34, %v1773_v50  ;;  %v242_v35 = vmul.f32 %v2524_v41, %v231_v1 }
  0xc0   :  { %v2358_v53 = vpop.eup %2357  ;;  %1993 = vmatprep.mubr.msk.f32.mxu0 %vm296_vm2, %v175_v52 }
  0xc1   :  { %v200_v56 = vadd.f32 %v2511_v39, %v196_v17  ;;  %v1774_v57 = vadd.f32 -1.0, %v2358_v53  ;;  %v246_v10 = vadd.f32 %v242_v35, %v222_v5  ;;  %v1783_v17 = vld [vmem:[%s2952_s4] ss:$0 sm:$0xff] }
  0xc3   :  { %v211_v60 = vpop.permute.xlu1 %210  ;;  %v176_v61 = vsel %vm160_vm6, %v156_v43, %v1774_v57  ;;  %v224_v26 = vadd.f32 %v220_v18, %v200_v56 }
  0xc4   :  { %1994 = vmatmul.mubr.msk.f32.gmra.mrb[2].mxu0 %vm296_vm2, %v176_v61  ;;  %v219_v15 = vmul.f32 %v2519_v40, %v211_v60 }
  0xc5   :  { %v248_v37 = vadd.f32 %v244_v28, %v224_v26 }
  0xc6   :  { %v223_v23 = vadd.f32 %v219_v15, %v2546_v11 }
  0xc8   :  { %v251_v4 = vpop.permute.xlu1 %250 }
  0xc9   :  { %v265_v7 = vmul.f32 %v2534_v48, %v251_v4 }
  0xcb   :  { %v269_v8 = vadd.f32 %v265_v7, %v245_v6 }
  0xcc   :  { %v255_v9 = vpop.permute.xlu1 %254 }
  0xcd   :  { %v277_v12 = vmul.f32 1.442695, %v269_v8  ;;  %v266_v13 = vmul.f32 %v2534_v48, %v255_v9  ;;  %vm273_vm7 = vcmp.gt.f32.partialorder %v269_v8, 0.0 }
  0xcf   :  { %2359 = vpow2.f32 %v277_v12  ;;  %v270_v14 = vadd.f32 %v266_v13, %v246_v10 }
  0xd1   :  { %v279_v16 = vmul.f32 1.442695, %v270_v14  ;;  %v235_v39 = vpop.permute.xlu1 %234  ;;  %vm274_vm8 = vcmp.gt.f32.partialorder %v270_v14, 0.0 }
  0xd2   :  { %v243_v19 = vmul.f32 %v2524_v41, %v235_v39 }
  0xd3   :  { %2361 = vpow2.f32 %v279_v16 }
  0xd4   :  { %v247_v29 = vadd.f32 %v243_v19, %v223_v23 }
  0xd6   :  { %v259_v25 = vpop.permute.xlu1 %258 }
  0xd7   :  { %v267_v30 = vmul.f32 %v2534_v48, %v259_v25 }
  0xd9   :  { %v2360_v31 = vpop.eup %2359  ;;  %v271_v33 = vadd.f32 %v267_v30, %v247_v29 }
  0xda   :  { %v263_v34 = vpop.permute.xlu1 %262  ;;  %v1775_v36 = vadd.f32 -1.0, %v2360_v31 }
  0xdb   :  { %v281_v38 = vmul.f32 1.442695, %v271_v33  ;;  %v268_v40 = vmul.f32 %v2534_v48, %v263_v34  ;;  %vm275_vm9 = vcmp.gt.f32.partialorder %v271_v33, 0.0 }
  0xdc   :  { %v289_v42 = vsel %vm273_vm7, %v269_v8, %v1775_v36  ;;  %v508_v8 = vlaneseq }
  0xdd   :  { %v2362_v43 = vpop.eup %2361  ;;  %2363 = vpow2.f32 %v281_v38  ;;  %v272_v11 = vadd.f32 %v268_v40, %v248_v37  ;;  %2000 = vmatprep.mubr.msk.f32.mxu0 %vm296_vm2, %v289_v42 }
  0xde   :  { %v1776_v44 = vadd.f32 -1.0, %v2362_v43  ;;  %v2616_v9 = vand.u32 127, %v508_v8 }
  0xdf   :  { %v283_v41 = vmul.f32 1.442695, %v272_v11  ;;  %vm276_vm10 = vcmp.gt.f32.partialorder %v272_v11, 0.0 }
  0xe0   :  { %v290_v45 = vsel %vm274_vm8, %v270_v14, %v1776_v44 }
  0xe1   :  { %2365 = vpow2.f32 %v283_v41  ;;  %2001 = vmatmul.mubr.msk.f32.vlgmr.msra.gmra.mrb[0].mxu0 %vm296_vm2, %v290_v45 }
  0xe7   :  { %v2364_v46 = vpop.eup %2363 }
  0xe8   :  { %v1777_v47 = vadd.f32 -1.0, %v2364_v46 }
  0xea   :  { %v291_v49 = vsel %vm275_vm9, %v271_v33, %v1777_v47 }
  0xeb   :  { %v2366_v50 = vpop.eup %2365  ;;  %2003 = vmatprep.mubr.msk.f32.mxu0 %vm296_vm2, %v291_v49 }
  0xec   :  { %v1778_v48 = vadd.f32 -1.0, %v2366_v50 }
  0xee   :  { %v292_v51 = vsel %vm276_vm10, %v272_v11, %v1778_v48 }
  0xef   :  { %2004 = vmatmul.mubr.msk.f32.gmra.mrb[2].mxu0 %vm296_vm2, %v292_v51 }
 0x1b4   :  { %v2002_v52 = vpop.f32.mrb[0].mxu0 }
 0x1b5   :  { %v485_v53 = vpop.f32.mrb[1].mxu0  ;;  %v2588_v55 = vadd.f32 %v2002_v52, %v1783_v17  ;;  %v1811_v52 = vld [vmem:[%s2949_s5 + $0x40] sm:$0xff] }
 0x1b6   :  { %v2586_v54 = vadd.f32 %v1783_v17, %v485_v53  ;;  %v1812_v53 = vld [vmem:[%s2949_s5 + $0x48] sm:$0xff] }
 0x1b8   :  { %2022 = vmatprep.mubr.msk.f32.mxu1 %vm518_vm0, %v2586_v54 }
 0x1b9   :  { %2023 = vmatmul.mubr.msk.f32.vlgmr.msra.gmra.mrb[0].mxu1 %vm518_vm0, %v2588_v55 }
 0x1ba   :  { %2195 = vmatpush3.bf16.msra.mxu1 %v2455_v21 }
 0x1bb   :  { %2197 = vmatprep.subr.bf16.mxu1 %v2463_v24 }
 0x1be   :  { %2199 = vmatpush3.bf16.msra.mxu1 %v2463_v24  ;;  %v1802_v24 = vld [vmem:[%s2953_s6] ss:$0 sm:$0xff] }
 0x1bf   :  { %2201 = vmatprep.subr.bf16.mxu1 %v2480_v27 }
 0x1c2   :  { %v2005_v56 = vpop.f32.mrb[2].mxu0  ;;  %2203 = vmatpush3.bf16.msra.mxu1 %v2480_v27 }
 0x1c3   :  { %v495_v57 = vpop.f32.mrb[3].mxu0  ;;  %2205 = vmatprep.subr.bf16.mxu1 %v2494_v32  ;;  %v2602_v59 = vadd.f32 %v2005_v56, %v1783_v17  ;;  %v1813_v56 = vld [vmem:[%s2949_s5 + $0x50] sm:$0xff] }
 0x1c4   :  { %v2600_v58 = vadd.f32 %v1783_v17, %v495_v57  ;;  %v2208_v57 = vpack.c.bf16 %v1812_v53, %v1811_v52 }
 0x1c6   :  { %2025 = vmatprep.mubr.msk.f32.mxu1 %vm518_vm0, %v2600_v58  ;;  %2207 = vmatpush3.bf16.msra.mxu1 %v2494_v32 }
 0x1c7   :  { %2026 = vmatmul.mubr.msk.f32.gmra.mrb[2].mxu1 %vm518_vm0, %v2602_v59  ;;  %2210 = vmatprep.subr.msk.bf16.mxu0 %vm2451_vm1, %v2208_v57 }
 0x1c8   :  { %2233 = vmatprep.subr.bf16.mxu1 %v2208_v57  ;;  %2213 = vmatpush3.bf16.xpose.msk.msra.mxu0 %vm2451_vm1, %v2208_v57 }
 0x28c   :  { %v2024_v21 = vpop.f32.mrb[0].mxu1 }
 0x28d   :  { %v642_v27 = vmul.f32 2.0, %v2024_v21  ;;  %v621_v60 = vpop.f32.mrb[1].mxu1  ;;  %v1814_v21 = vld [vmem:[%s2949_s5 + $0x58] sm:$0xff] }
 0x28e   :  { %v641_v61 = vmul.f32 2.0, %v621_v60  ;;  %v1816_v60 = vld [vmem:[%s2949_s5 + $0x68] sm:$0xff] }
 0x28f   :  { %v650_v62 = vsub.f32 %v1802_v24, %v642_v27  ;;  %v1815_v27 = vld [vmem:[%s2949_s5 + $0x60] sm:$0xff] }
 0x290   :  { %v649_v63 = vsub.f32 %v1802_v24, %v641_v61  ;;  %v2220_v61 = vpack.c.bf16 %v1816_v60, %v1815_v27 }
 0x291   :  { %v657_v0 = vsel %vm653_vm11, %v650_v62, inf }
 0x292   :  { %658 = vmin.xlane.f32.xlu1 %v657_v0  ;;  %v654_v1 = vsel %vm653_vm11, %v649_v63, inf }
 0x293   :  { %655 = vmin.xlane.f32.xlu0 %v654_v1 }
 0x29a   :  { %v2027_v32 = vpop.f32.mrb[2].mxu1 }
 0x29b   :  { %v631_v2 = vpop.f32.mrb[3].mxu1  ;;  %v644_v3 = vmul.f32 2.0, %v2027_v32 }
 0x29c   :  { %v643_v4 = vmul.f32 2.0, %v631_v2 }
 0x29d   :  { %v652_v6 = vsub.f32 %v1802_v24, %v644_v3 }
 0x29e   :  { %v651_v5 = vsub.f32 %v1802_v24, %v643_v4  ;;  %v2214_v24 = vpack.c.bf16 %v1814_v21, %v1813_v56 }
 0x29f   :  { %v663_v7 = vsel %vm653_vm11, %v652_v6, inf }
 0x2a0   :  { %v660_v35 = vsel %vm653_vm11, %v651_v5, inf  ;;  %2216 = vmatprep.subr.msk.bf16.mxu0 %vm2451_vm1, %v2214_v24 }
 0x2a1   :  { %661 = vmin.xlane.f32.xlu0 %v660_v35  ;;  %2219 = vmatpush3.bf16.xpose.msk.msra.mxu0 %vm2451_vm1, %v2214_v24 }
 0x2a2   :  { %2222 = vmatprep.subr.msk.bf16.mxu0 %vm2451_vm1, %v2220_v61 }
 0x2a5   :  { %664 = vmin.xlane.f32.xlu0 %v663_v7 }
 0x2a9   :  { %2225 = vmatpush3.bf16.xpose.msk.msra.mxu0 %vm2451_vm1, %v2220_v61 }
 0x31f   :  { %v659_v10 = vpop.xlane.xlu1 %658 }
 0x320   :  { %vm667_vm12 = vcmp.eq.f32.partialorder %v650_v62, %v659_v10  ;;  %v656_v12 = vpop.xlane.xlu0 %655  ;;  %v1817_v62 = vld [vmem:[%s2949_s5 + $0x70] sm:$0xff]  ;;  %v2375_v10 = vmov 0.0  }
 0x321   :  { %v671_v13 = vsel %vm667_vm12, %v2616_v9, 64  ;;  %vm666_vm13 = vcmp.eq.f32.partialorder %v649_v63, %v656_v12  ;;  %v1818_v63 = vld [vmem:[%s2949_s5 + $0x78] sm:$0xff] }
 0x322   :  { %v689_v14 = vsel %vm653_vm11, %v671_v13, 2147483647  ;;  %v670_v15 = vsel %vm666_vm13, %v2616_v9, 64  ;;  %v2226_v0 = vpack.c.bf16 %v1818_v63, %v1817_v62 }
 0x323   :  { %v674_v16 = vsel %vm653_vm11, %v670_v15, 2147483647  ;;  %v691_v39 = vshra.s32 %v689_v14, 16  ;;  %v690_v37 = vand.u32 65535, %v689_v14 }
 0x324   :  { %v676_v18 = vshra.s32 %v674_v16, 16  ;;  %v675_v38 = vand.u32 65535, %v674_v16  ;;  %2228 = vmatprep.subr.msk.bf16.mxu0 %vm2451_vm1, %v2226_v0 }
 0x325   :  { %v693_v19 = vcvt.s32.f32 %v691_v39  ;;  %v692_v42 = vcvt.s32.f32 %v690_v37  ;;  %2231 = vmatpush3.bf16.xpose.msk.msra.mxu0 %vm2451_vm1, %v2226_v0 }
 0x326   :  { %v678_v22 = vcvt.s32.f32 %v676_v18  ;;  %v677_v11 = vcvt.s32.f32 %v675_v38 }
 0x327   :  { %694 = vmin.xlane.f32.xlu0 %v693_v19 }
 0x328   :  { %679 = vmin.xlane.f32.xlu1 %v678_v22 }
 0x32e   :  { %v662_v23 = vpop.xlane.xlu0 %661 }
 0x32f   :  { %vm668_vm14 = vcmp.eq.f32.partialorder %v651_v5, %v662_v23 }
 0x330   :  { %v672_v25 = vsel %vm668_vm14, %v2616_v9, 64 }
 0x331   :  { %v704_v26 = vsel %vm653_vm11, %v672_v25, 2147483647 }
 0x332   :  { %v665_v28 = vpop.xlane.xlu0 %664  ;;  %v706_v29 = vshra.s32 %v704_v26, 16  ;;  %v705_v45 = vand.u32 65535, %v704_v26 }
 0x333   :  { %vm669_vm15 = vcmp.eq.f32.partialorder %v652_v6, %v665_v28 }
 0x334   :  { %v673_v30 = vsel %vm669_vm15, %v2616_v9, 64  ;;  %v708_v31 = vcvt.s32.f32 %v706_v29  ;;  %v707_v47 = vcvt.s32.f32 %v705_v45 }
 0x335   :  { %v719_v33 = vsel %vm653_vm11, %v673_v30, 2147483647 }
 0x336   :  { %709 = vmin.xlane.f32.xlu1 %v708_v31  ;;  %v721_v34 = vshra.s32 %v719_v33, 16  ;;  %v720_v49 = vand.u32 65535, %v719_v33 }
 0x338   :  { %v723_v36 = vcvt.s32.f32 %v721_v34  ;;  %v722_v51 = vcvt.s32.f32 %v720_v49 }
 0x33a   :  { %724 = vmin.xlane.f32.xlu0 %v723_v36 }
 0x3b4   :  { %v695_v40 = vpop.xlane.xlu0 %694 }
 0x3b5   :  { %v680_v43 = vpop.xlane.xlu1 %679  ;;  %vm696_vm2 = vcmp.eq.f32.partialorder %v693_v19, %v695_v40  ;;  %v701_v1 = vcvt.f32.s32 %v695_v40 }
 0x3b6   :  { %v697_v44 = vsel %vm696_vm2, %v692_v42, inf  ;;  %vm681_vm3 = vcmp.eq.f32.partialorder %v678_v22, %v680_v43  ;;  %v686_v32 = vcvt.f32.s32 %v680_v43 }
 0x3b7   :  { %698 = vmin.xlane.f32.xlu0 %v697_v44  ;;  %v682_v41 = vsel %vm681_vm3, %v677_v11, inf  ;;  %v702_v3 = vshll.u32 %v701_v1, 16 }
 0x3b8   :  { %683 = vmin.xlane.f32.xlu1 %v682_v41  ;;  %v687_v35 = vshll.u32 %v686_v32, 16 }
 0x3c3   :  { %v710_v46 = vpop.xlane.xlu1 %709 }
 0x3c4   :  { %vm711_vm4 = vcmp.eq.f32.partialorder %v708_v31, %v710_v46  ;;  %v716_v14 = vcvt.f32.s32 %v710_v46 }
 0x3c5   :  { %v712_v50 = vsel %vm711_vm4, %v707_v47, inf }
 0x3c6   :  { %713 = vmin.xlane.f32.xlu1 %v712_v50  ;;  %v717_v16 = vshll.u32 %v716_v14, 16 }
 0x3c7   :  { %v725_v48 = vpop.xlane.xlu0 %724 }
 0x3c8   :  { %vm726_vm5 = vcmp.eq.f32.partialorder %v723_v36, %v725_v48  ;;  %v731_v39 = vcvt.f32.s32 %v725_v48 }
 0x3c9   :  { %v727_v17 = vsel %vm726_vm5, %v722_v51, inf }
 0x3ca   :  { %728 = vmin.xlane.f32.xlu0 %v727_v17  ;;  %v732_v23 = vshll.u32 %v731_v39, 16 }
 0x444   :  { %v699_v2 = vpop.xlane.xlu0 %698 }
 0x445   :  { %v700_v4 = vcvt.f32.s32 %v699_v2  ;;  %v684_v5 = vpop.xlane.xlu1 %683 }
 0x446   :  { %v685_v6 = vcvt.f32.s32 %v684_v5 }
 0x447   :  { %v2666_v7 = vadd.s32 %v702_v3, %v700_v4 }
 0x448   :  { %v2668_v8 = vadd.s32 %v687_v35, %v685_v6 }
 0x449   :  { %vm735_vm6 = vcmp.eq.s32.totalorder %v2616_v9, %v2666_v7 }
 0x44a   :  { %vm734_vm7 = vcmp.eq.s32.totalorder %v2616_v9, %v2668_v8  ;;  %v1804_v13 = vsel %vm735_vm6, 1.0, %v2375_v10 }
 0x44b   :  { %v1803_v12 = vsel %vm734_vm7, 1.0, %v2375_v10 }
 0x44c   :  { %2044 = vmatprep.mubr.msk.f32.mxu1 %vm653_vm11, %v1803_v12 }
 0x44d   :  { %2045 = vmatmul.mubr.msk.f32.vlgmr.msra.gmra.mrb[4].mxu1 %vm653_vm11, %v1804_v13 }
 0x44e   :  { %2235 = vmatpush3.bf16.msra.mxu1 %v2208_v57 }
 0x44f   :  { %2237 = vmatprep.subr.bf16.mxu1 %v2214_v24 }
 0x452   :  { %2239 = vmatpush3.bf16.msra.mxu1 %v2214_v24 }
 0x453   :  { %v714_v15 = vpop.xlane.xlu1 %713  ;;  %2241 = vmatprep.subr.bf16.mxu1 %v2220_v61 }
 0x454   :  { %v715_v18 = vcvt.f32.s32 %v714_v15 }
 0x456   :  { %v2678_v19 = vadd.s32 %v717_v16, %v715_v18  ;;  %2243 = vmatpush3.bf16.msra.mxu1 %v2220_v61 }
 0x457   :  { %v729_v22 = vpop.xlane.xlu0 %728  ;;  %2245 = vmatprep.subr.bf16.mxu1 %v2226_v0 }
 0x458   :  { %v730_v25 = vcvt.f32.s32 %v729_v22  ;;  %vm736_vm8 = vcmp.eq.s32.totalorder %v2616_v9, %v2678_v19 }
 0x459   :  { %v1805_v26 = vsel %vm736_vm8, 1.0, %v2375_v10 }
 0x45a   :  { %v2683_v28 = vadd.s32 %v732_v23, %v730_v25  ;;  %2047 = vmatprep.mubr.msk.f32.mxu1 %vm653_vm11, %v1805_v26  ;;  %2247 = vmatpush3.bf16.msra.mxu1 %v2226_v0 }
 0x45c   :  { %vm737_vm9 = vcmp.eq.s32.totalorder %v2616_v9, %v2683_v28 }
 0x45d   :  { %v1806_v29 = vsel %vm737_vm9, 1.0, %v2375_v10 }
 0x45e   :  { %2048 = vmatmul.mubr.msk.f32.gmra.mrb[6].mxu1 %vm653_vm11, %v1806_v29 }
 0x520   :  { %v2046_v30 = vpop.f32.mrb[4].mxu1 }
 0x521   :  { %v824_v31 = vpop.f32.mrb[5].mxu1  ;;  %v2694_v34 = vsub.f32 %v2588_v55, %v2046_v30  ;;  %v1831_v55 = vld [vmem:[%s2953_s6 + $0x1] ss:$0 sm:$0xff] }
 0x522   :  { %v2691_v33 = vsub.f32 %v2586_v54, %v824_v31 }
 0x524   :  { %2066 = vmatprep.mubr.msk.f32.mxu0 %vm518_vm0, %v2691_v33 }
 0x525   :  { %2067 = vmatmul.mubr.msk.f32.vlgmr.msra.gmra.mrb[4].mxu0 %vm518_vm0, %v2694_v34 }
 0x531   :  { %v2049_v36 = vpop.f32.mrb[6].mxu1 }
 0x532   :  { %v834_v37 = vpop.f32.mrb[7].mxu1  ;;  %v2704_v40 = vsub.f32 %v2602_v59, %v2049_v36 }
 0x533   :  { %v2701_v38 = vsub.f32 %v2600_v58, %v834_v37 }
 0x535   :  { %2069 = vmatprep.mubr.msk.f32.mxu0 %vm518_vm0, %v2701_v38 }
 0x536   :  { %2070 = vmatmul.mubr.msk.f32.gmra.mrb[6].mxu0 %vm518_vm0, %v2704_v40 }
 0x5f8   :  { %v2068_v54 = vpop.f32.mrb[4].mxu0 }
 0x5f9   :  { %v979_v42 = vmul.f32 2.0, %v2068_v54  ;;  %v958_v43 = vpop.f32.mrb[5].mxu0  ;;  %v1840_v54 = vld [vmem:[%s2949_s5 + $0x80] sm:$0xff] }
 0x5fa   :  { %v978_v11 = vmul.f32 2.0, %v958_v43 }
 0x5fb   :  { %v987_v44 = vsub.f32 %v1831_v55, %v979_v42  ;;  %v1842_v42 = vld [vmem:[%s2949_s5 + $0x90] sm:$0xff] }
 0x5fc   :  { %v986_v58 = vsub.f32 %v1831_v55, %v978_v11  ;;  %v1843_v11 = vld [vmem:[%s2949_s5 + $0x98] sm:$0xff] }
 0x5fd   :  { %v993_v41 = vsel %vm653_vm11, %v987_v44, inf }
 0x5fe   :  { %994 = vmin.xlane.f32.xlu0 %v993_v41  ;;  %v990_v59 = vsel %vm653_vm11, %v986_v58, inf  ;;  %v1845_v41 = vld [vmem:[%s2949_s5 + $0xa8] sm:$0xff] }
 0x5ff   :  { %991 = vmin.xlane.f32.xlu1 %v990_v59 }
 0x609   :  { %v2071_v45 = vpop.f32.mrb[6].mxu0 }
 0x60a   :  { %v981_v46 = vmul.f32 2.0, %v2071_v45  ;;  %v968_v47 = vpop.f32.mrb[7].mxu0  ;;  %v1846_v45 = vld [vmem:[%s2949_s5 + $0xb0] sm:$0xff] }
 0x60b   :  { %v980_v49 = vmul.f32 2.0, %v968_v47 }
 0x60c   :  { %v989_v50 = vsub.f32 %v1831_v55, %v981_v46  ;;  %v1847_v46 = vld [vmem:[%s2949_s5 + $0xb8] sm:$0xff] }
 0x60d   :  { %v988_v48 = vsub.f32 %v1831_v55, %v980_v49  ;;  %v1841_v55 = vld [vmem:[%s2949_s5 + $0x88] sm:$0xff]  ;;  %v2266_v47 = vpack.c.bf16 %v1847_v46, %v1846_v45 }
 0x60e   :  { %v999_v51 = vsel %vm653_vm11, %v989_v50, inf  ;;  %v2248_v43 = vpack.c.bf16 %v1841_v55, %v1840_v54 }
 0x60f   :  { %1000 = vmin.xlane.f32.xlu0 %v999_v51  ;;  %v996_v17 = vsel %vm653_vm11, %v988_v48, inf }
 0x610   :  { %997 = vmin.xlane.f32.xlu1 %v996_v17  ;;  %2250 = vmatprep.subr.msk.bf16.mxu1 %vm2451_vm1, %v2248_v43 }
 0x611   :  { %2273 = vmatprep.subr.bf16.mxu0 %v2248_v43 }
 0x612   :  { %2275 = vmatpush3.bf16.msra.mxu0 %v2248_v43 }
 0x68b   :  { %v995_v52 = vpop.xlane.xlu0 %994 }
 0x68c   :  { %vm1003_vm10 = vcmp.eq.f32.partialorder %v987_v44, %v995_v52  ;;  %v992_v53 = vpop.xlane.xlu1 %991  ;;  %v2254_v44 = vpack.c.bf16 %v1843_v11, %v1842_v42 }
 0x68d   :  { %v1007_v56 = vsel %vm1003_vm10, %v2616_v9, 64  ;;  %vm1002_vm12 = vcmp.eq.f32.partialorder %v986_v58, %v992_v53  ;;  %v1844_v58 = vld [vmem:[%s2949_s5 + $0xa0] sm:$0xff] }
 0x68e   :  { %v1025_v57 = vsel %vm653_vm11, %v1007_v56, 2147483647  ;;  %v1006_v21 = vsel %vm1002_vm12, %v2616_v9, 64  ;;  %2277 = vmatprep.subr.bf16.mxu0 %v2254_v44  ;;  %v2260_v59 = vpack.c.bf16 %v1845_v41, %v1844_v58 }
 0x68f   :  { %v1010_v24 = vsel %vm653_vm11, %v1006_v21, 2147483647  ;;  %v1027_v27 = vshra.s32 %v1025_v57, 16  ;;  %v1026_v12 = vand.u32 65535, %v1025_v57  ;;  %2279 = vmatpush3.bf16.msra.mxu0 %v2254_v44 }
 0x690   :  { %v1012_v60 = vshra.s32 %v1010_v24, 16  ;;  %v1011_v13 = vand.u32 65535, %v1010_v24  ;;  %2281 = vmatprep.subr.bf16.mxu0 %v2260_v59 }
 0x691   :  { %v1029_v61 = vcvt.s32.f32 %v1027_v27  ;;  %v1028_v15 = vcvt.s32.f32 %v1026_v12 }
 0x692   :  { %v1014_v62 = vcvt.s32.f32 %v1012_v60  ;;  %v1013_v39 = vcvt.s32.f32 %v1011_v13 }
 0x693   :  { %1030 = vmin.xlane.f32.xlu0 %v1029_v61  ;;  %2283 = vmatpush3.bf16.msra.mxu0 %v2260_v59 }
 0x694   :  { %1015 = vmin.xlane.f32.xlu1 %v1014_v62  ;;  %2285 = vmatprep.subr.bf16.mxu0 %v2266_v47 }
 0x697   :  { %2287 = vmatpush3.bf16.msra.mxu0 %v2266_v47 }
 0x69c   :  { %v1001_v63 = vpop.xlane.xlu0 %1000 }
 0x69d   :  { %vm1005_vm13 = vcmp.eq.f32.partialorder %v989_v50, %v1001_v63  ;;  %v998_v0 = vpop.xlane.xlu1 %997 }
 0x69e   :  { %v1009_v1 = vsel %vm1005_vm13, %v2616_v9, 64  ;;  %vm1004_vm14 = vcmp.eq.f32.partialorder %v988_v48, %v998_v0 }
 0x69f   :  { %v1055_v32 = vsel %vm653_vm11, %v1009_v1, 2147483647  ;;  %v1008_v2 = vsel %vm1004_vm14, %v2616_v9, 64 }
 0x6a0   :  { %v1040_v3 = vsel %vm653_vm11, %v1008_v2, 2147483647  ;;  %v1057_v4 = vshra.s32 %v1055_v32, 16  ;;  %v1056_v23 = vand.u32 65535, %v1055_v32 }
 0x6a1   :  { %v1042_v5 = vshra.s32 %v1040_v3, 16  ;;  %v1041_v25 = vand.u32 65535, %v1040_v3 }
 0x6a2   :  { %v1059_v35 = vcvt.s32.f32 %v1057_v4  ;;  %v1058_v29 = vcvt.s32.f32 %v1056_v23 }
 0x6a3   :  { %v1044_v6 = vcvt.s32.f32 %v1042_v5  ;;  %v1043_v31 = vcvt.s32.f32 %v1041_v25 }
 0x6a4   :  { %1060 = vmin.xlane.f32.xlu0 %v1059_v35 }
 0x6a5   :  { %1045 = vmin.xlane.f32.xlu1 %v1044_v6 }
 0x720   :  { %v1031_v14 = vpop.xlane.xlu0 %1030 }
 0x721   :  { %v1016_v16 = vpop.xlane.xlu1 %1015  ;;  %vm1032_vm15 = vcmp.eq.f32.partialorder %v1029_v61, %v1031_v14  ;;  %v1037_v49 = vcvt.f32.s32 %v1031_v14 }
 0x722   :  { %v1033_v18 = vsel %vm1032_vm15, %v1028_v15, inf  ;;  %vm1017_vm2 = vcmp.eq.f32.partialorder %v1014_v62, %v1016_v16  ;;  %v1022_v50 = vcvt.f32.s32 %v1016_v16 }
 0x723   :  { %1034 = vmin.xlane.f32.xlu0 %v1033_v18  ;;  %v1018_v22 = vsel %vm1017_vm2, %v1013_v39, inf  ;;  %v1038_v51 = vshll.u32 %v1037_v49, 16 }
 0x724   :  { %1019 = vmin.xlane.f32.xlu1 %v1018_v22  ;;  %v1023_v53 = vshll.u32 %v1022_v50, 16 }
 0x731   :  { %v1061_v26 = vpop.xlane.xlu0 %1060 }
 0x732   :  { %v1046_v30 = vpop.xlane.xlu1 %1045  ;;  %vm1062_vm3 = vcmp.eq.f32.partialorder %v1059_v35, %v1061_v26  ;;  %v1067_v60 = vcvt.f32.s32 %v1061_v26 }
 0x733   :  { %v1063_v36 = vsel %vm1062_vm3, %v1058_v29, inf  ;;  %vm1047_vm4 = vcmp.eq.f32.partialorder %v1044_v6, %v1046_v30  ;;  %v1052_v61 = vcvt.f32.s32 %v1046_v30 }
 0x734   :  { %1064 = vmin.xlane.f32.xlu0 %v1063_v36  ;;  %v1048_v37 = vsel %vm1047_vm4, %v1043_v31, inf  ;;  %v1068_v63 = vshll.u32 %v1067_v60, 16  ;;  %vm1742_vm4 = vcmask 7168  }
 0x735   :  { %1049 = vmin.xlane.f32.xlu1 %v1048_v37  ;;  %v1053_v32 = vshll.u32 %v1052_v61, 16 }
 0x7b0   :  { %v1035_v48 = vpop.xlane.xlu0 %1034 }
 0x7b1   :  { %v1036_v17 = vcvt.f32.s32 %v1035_v48  ;;  %v1020_v52 = vpop.xlane.xlu1 %1019 }
 0x7b2   :  { %v1021_v56 = vcvt.f32.s32 %v1020_v52 }
 0x7b3   :  { %v2751_v57 = vadd.s32 %v1038_v51, %v1036_v17 }
 0x7b4   :  { %v2753_v21 = vadd.s32 %v1023_v53, %v1021_v56 }
 0x7b5   :  { %vm1071_vm5 = vcmp.eq.s32.totalorder %v2616_v9, %v2751_v57 }
 0x7b6   :  { %vm1070_vm6 = vcmp.eq.s32.totalorder %v2616_v9, %v2753_v21  ;;  %v1833_v27 = vsel %vm1071_vm5, 1.0, %v2375_v10  ;;  %vm1747_vm5 = vcmask 15360  }
 0x7b7   :  { %v1832_v24 = vsel %vm1070_vm6, 1.0, %v2375_v10 }
 0x7b8   :  { %2088 = vmatprep.mubr.msk.f32.mxu1 %vm653_vm11, %v1832_v24 }
 0x7b9   :  { %2089 = vmatmul.mubr.msk.f32.vlgmr.msra.gmra.mrb[8].mxu1 %vm653_vm11, %v1833_v27 }
 0x7ba   :  { %2253 = vmatpush3.bf16.xpose.msk.msra.mxu1 %vm2451_vm1, %v2248_v43 }
 0x7bb   :  { %2256 = vmatprep.subr.msk.bf16.mxu1 %vm2451_vm1, %v2254_v44 }
 0x7c1   :  { %v1065_v62 = vpop.xlane.xlu0 %1064 }
 0x7c2   :  { %v1066_v0 = vcvt.f32.s32 %v1065_v62  ;;  %v1050_v1 = vpop.xlane.xlu1 %1049  ;;  %2259 = vmatpush3.bf16.xpose.msk.msra.mxu1 %vm2451_vm1, %v2254_v44 }
 0x7c3   :  { %v1051_v2 = vcvt.f32.s32 %v1050_v1  ;;  %2262 = vmatprep.subr.msk.bf16.mxu1 %vm2451_vm1, %v2260_v59 }
 0x7c4   :  { %v2771_v3 = vadd.s32 %v1068_v63, %v1066_v0 }
 0x7c5   :  { %v2773_v4 = vadd.s32 %v1053_v32, %v1051_v2 }
 0x7c6   :  { %vm1073_vm7 = vcmp.eq.s32.totalorder %v2616_v9, %v2771_v3 }
 0x7c7   :  { %vm1072_vm8 = vcmp.eq.s32.totalorder %v2616_v9, %v2773_v4  ;;  %v1835_v35 = vsel %vm1073_vm7, 1.0, %v2375_v10 }
 0x7c8   :  { %v1834_v5 = vsel %vm1072_vm8, 1.0, %v2375_v10 }
 0x7c9   :  { %2091 = vmatprep.mubr.msk.f32.mxu1 %vm653_vm11, %v1834_v5 }
 0x7ca   :  { %2092 = vmatmul.mubr.msk.f32.gmra.mrb[10].mxu1 %vm653_vm11, %v1835_v35 }
 0x7cb   :  { %2265 = vmatpush3.bf16.xpose.msk.msra.mxu1 %vm2451_vm1, %v2260_v59 }
 0x7cc   :  { %2268 = vmatprep.subr.msk.bf16.mxu1 %vm2451_vm1, %v2266_v47 }
 0x7d3   :  { %2271 = vmatpush3.bf16.xpose.msk.msra.mxu1 %vm2451_vm1, %v2266_v47 }
 0x88c   :  { %v2090_v6 = vpop.f32.mrb[8].mxu1 }
 0x88d   :  { %v1160_v12 = vpop.f32.mrb[9].mxu1  ;;  %v2793_v14 = vsub.f32 %v2694_v34, %v2090_v6  ;;  %v1860_v34 = vld [vmem:[%s2953_s6 + $0x2] ss:$0 sm:$0xff] }
 0x88e   :  { %v2790_v13 = vsub.f32 %v2691_v33, %v1160_v12 }
 0x890   :  { %2110 = vmatprep.mubr.msk.f32.mxu1 %vm518_vm0, %v2790_v13 }
 0x891   :  { %2111 = vmatmul.mubr.msk.f32.vlgmr.msra.gmra.mrb[12].mxu1 %vm518_vm0, %v2793_v14 }
 0x89d   :  { %v2093_v15 = vpop.f32.mrb[10].mxu1 }
 0x89e   :  { %v1170_v16 = vpop.f32.mrb[11].mxu1  ;;  %v2803_v18 = vsub.f32 %v2704_v40, %v2093_v15 }
 0x89f   :  { %v2800_v39 = vsub.f32 %v2701_v38, %v1170_v16 }
 0x8a1   :  { %2113 = vmatprep.mubr.msk.f32.mxu1 %vm518_vm0, %v2800_v39 }
 0x8a2   :  { %2114 = vmatmul.mubr.msk.f32.gmra.mrb[14].mxu1 %vm518_vm0, %v2803_v18 }
 0x964   :  { %v2112_v33 = vpop.f32.mrb[12].mxu1 }
 0x965   :  { %v1315_v22 = vmul.f32 2.0, %v2112_v33  ;;  %v1294_v23 = vpop.f32.mrb[13].mxu1 }
 0x966   :  { %v1314_v25 = vmul.f32 2.0, %v1294_v23 }
 0x967   :  { %v1323_v26 = vsub.f32 %v1860_v34, %v1315_v22 }
 0x968   :  { %v1322_v38 = vsub.f32 %v1860_v34, %v1314_v25  ;;  %v1869_v25 = vld [vmem:[%s2949_s5 + $0xc0] sm:$0xff] }
 0x969   :  { %v1329_v29 = vsel %vm653_vm11, %v1323_v26, inf }
 0x96a   :  { %1330 = vmin.xlane.f32.xlu0 %v1329_v29  ;;  %v1326_v40 = vsel %vm653_vm11, %v1322_v38, inf }
 0x96b   :  { %1327 = vmin.xlane.f32.xlu1 %v1326_v40 }
 0x975   :  { %v2115_v30 = vpop.f32.mrb[14].mxu1 }
 0x976   :  { %v1317_v31 = vmul.f32 2.0, %v2115_v30  ;;  %v1304_v36 = vpop.f32.mrb[15].mxu1 }
 0x977   :  { %v1316_v37 = vmul.f32 2.0, %v1304_v36 }
 0x978   :  { %v1325_v54 = vsub.f32 %v1860_v34, %v1317_v31 }
 0x979   :  { %v1324_v55 = vsub.f32 %v1860_v34, %v1316_v37 }
 0x97a   :  { %v1335_v42 = vsel %vm653_vm11, %v1325_v54, inf }
 0x97b   :  { %1336 = vmin.xlane.f32.xlu0 %v1335_v42  ;;  %v1332_v43 = vsel %vm653_vm11, %v1324_v55, inf }
 0x97c   :  { %1333 = vmin.xlane.f32.xlu1 %v1332_v43  ;;  %v1744_v43 = vsel %vm1742_vm4, %v2666_v7, %v2751_v57 }
 0x9f7   :  { %v1331_v11 = vpop.xlane.xlu0 %1330 }
 0x9f8   :  { %vm1339_vm9 = vcmp.eq.f32.partialorder %v1323_v26, %v1331_v11  ;;  %v1328_v44 = vpop.xlane.xlu1 %1327  ;;  %v1870_v26 = vld [vmem:[%s2949_s5 + $0xc8] sm:$0xff] }
 0x9f9   :  { %v1343_v58 = vsel %vm1339_vm9, %v2616_v9, 64  ;;  %vm1338_vm10 = vcmp.eq.f32.partialorder %v1322_v38, %v1328_v44  ;;  %v2288_v38 = vpack.c.bf16 %v1870_v26, %v1869_v25  ;;  %v1871_v44 = vld [vmem:[%s2949_s5 + $0xd0] sm:$0xff] }
 0x9fa   :  { %v1361_v41 = vsel %vm653_vm11, %v1343_v58, 2147483647  ;;  %v1342_v59 = vsel %vm1338_vm10, %v2616_v9, 64  ;;  %v1872_v58 = vld [vmem:[%s2949_s5 + $0xd8] sm:$0xff] }
 0x9fb   :  { %v1346_v45 = vsel %vm653_vm11, %v1342_v59, 2147483647  ;;  %v1363_v46 = vshra.s32 %v1361_v41, 16  ;;  %v1362_v62 = vand.u32 65535, %v1361_v41  ;;  %2290 = vmatprep.subr.msk.bf16.mxu0 %vm2451_vm1, %v2288_v38  ;;  %v1743_v41 = vsel %vm1742_vm4, %v2668_v8, %v2753_v21  ;;  %v1873_v8 = vld [vmem:[%s2949_s5 + $0xe0] sm:$0xff]  ;;  %v1874_v21 = vld [vmem:[%s2949_s5 + $0xe8] sm:$0xff] }
 0x9fc   :  { %v1348_v47 = vshra.s32 %v1346_v45, 16  ;;  %v1347_v63 = vand.u32 65535, %v1346_v45  ;;  %v2294_v45 = vpack.c.bf16 %v1872_v58, %v1871_v44 }
 0x9fd   :  { %v1365_v49 = vcvt.s32.f32 %v1363_v46  ;;  %v1364_v1 = vcvt.s32.f32 %v1362_v62  ;;  %v1876_v62 = vld [vmem:[%s2949_s5 + $0xf8] sm:$0xff] }
 0x9fe   :  { %v1350_v50 = vcvt.s32.f32 %v1348_v47  ;;  %v1349_v2 = vcvt.s32.f32 %v1347_v63  ;;  %v1745_v63 = vsel %vm1742_vm4, %v2678_v19, %v2773_v4 }
 0x9ff   :  { %1366 = vmin.xlane.f32.xlu0 %v1365_v49 }
 0xa00   :  { %1351 = vmin.xlane.f32.xlu1 %v1350_v50 }
 0xa08   :  { %v1337_v48 = vpop.xlane.xlu0 %1336 }
 0xa09   :  { %vm1341_vm12 = vcmp.eq.f32.partialorder %v1325_v54, %v1337_v48  ;;  %v1334_v51 = vpop.xlane.xlu1 %1333 }
 0xa0a   :  { %v1345_v17 = vsel %vm1341_vm12, %v2616_v9, 64  ;;  %vm1340_vm13 = vcmp.eq.f32.partialorder %v1324_v55, %v1334_v51 }
 0xa0b   :  { %v1391_v52 = vsel %vm653_vm11, %v1345_v17, 2147483647  ;;  %v1344_v53 = vsel %vm1340_vm13, %v2616_v9, 64 }
 0xa0c   :  { %v1376_v56 = vsel %vm653_vm11, %v1344_v53, 2147483647  ;;  %v1393_v24 = vshra.s32 %v1391_v52, 16  ;;  %v1392_v6 = vand.u32 65535, %v1391_v52 }
 0xa0d   :  { %v1378_v27 = vshra.s32 %v1376_v56, 16  ;;  %v1377_v12 = vand.u32 65535, %v1376_v56 }
 0xa0e   :  { %v1395_v60 = vcvt.s32.f32 %v1393_v24  ;;  %v1394_v16 = vcvt.s32.f32 %v1392_v6 }
 0xa0f   :  { %v1380_v61 = vcvt.s32.f32 %v1378_v27  ;;  %v1379_v34 = vcvt.s32.f32 %v1377_v12  ;;  %v1746_v27 = vsel %vm1742_vm4, %v2683_v28, %v2771_v3 }
 0xa10   :  { %1396 = vmin.xlane.f32.xlu0 %v1395_v60 }
 0xa11   :  { %1381 = vmin.xlane.f32.xlu1 %v1380_v61 }
 0xa8c   :  { %v1367_v0 = vpop.xlane.xlu0 %1366 }
 0xa8d   :  { %v1352_v32 = vpop.xlane.xlu1 %1351  ;;  %vm1368_vm14 = vcmp.eq.f32.partialorder %v1365_v49, %v1367_v0  ;;  %v1373_v29 = vcvt.f32.s32 %v1367_v0 }
 0xa8e   :  { %v1369_v5 = vsel %vm1368_vm14, %v1364_v1, inf  ;;  %vm1353_vm15 = vcmp.eq.f32.partialorder %v1350_v50, %v1352_v32  ;;  %v1358_v40 = vcvt.f32.s32 %v1352_v32  ;;  %v2300_v50 = vpack.c.bf16 %v1874_v21, %v1873_v8 }
 0xa8f   :  { %1370 = vmin.xlane.f32.xlu0 %v1369_v5  ;;  %v1354_v35 = vsel %vm1353_vm15, %v1349_v2, inf  ;;  %v1374_v31 = vshll.u32 %v1373_v29, 16 }
 0xa90   :  { %1355 = vmin.xlane.f32.xlu1 %v1354_v35  ;;  %v1359_v54 = vshll.u32 %v1358_v40, 16 }
 0xa9d   :  { %v1397_v15 = vpop.xlane.xlu0 %1396 }
 0xa9e   :  { %v1382_v33 = vpop.xlane.xlu1 %1381  ;;  %vm1398_vm2 = vcmp.eq.f32.partialorder %v1395_v60, %v1397_v15  ;;  %v1403_v47 = vcvt.f32.s32 %v1397_v15 }
 0xa9f   :  { %v1399_v22 = vsel %vm1398_vm2, %v1394_v16, inf  ;;  %vm1383_vm3 = vcmp.eq.f32.partialorder %v1380_v61, %v1382_v33  ;;  %v1388_v49 = vcvt.f32.s32 %v1382_v33  ;;  %v1875_v61 = vld [vmem:[%s2949_s5 + $0xf0] sm:$0xff]  ;;  %vm1752_vm2 = vcmask 23552  }
 0xaa0   :  { %1400 = vmin.xlane.f32.xlu0 %v1399_v22  ;;  %v1384_v23 = vsel %vm1383_vm3, %v1379_v34, inf  ;;  %v1404_v51 = vshll.u32 %v1403_v47, 16  ;;  %v2306_v1 = vpack.c.bf16 %v1876_v62, %v1875_v61  ;;  %vm1757_vm3 = vcmask 31744  }
 0xaa1   :  { %1385 = vmin.xlane.f32.xlu1 %v1384_v23  ;;  %v1389_v53 = vshll.u32 %v1388_v49, 16 }
 0xb1c   :  { %v1371_v30 = vpop.xlane.xlu0 %1370 }
 0xb1d   :  { %v1372_v36 = vcvt.f32.s32 %v1371_v30  ;;  %v1356_v37 = vpop.xlane.xlu1 %1355 }
 0xb1e   :  { %v1357_v55 = vcvt.f32.s32 %v1356_v37 }
 0xb1f   :  { %v1375_v42 = vadd.s32 %v1374_v31, %v1372_v36 }
 0xb20   :  { %v1360_v11 = vadd.s32 %v1359_v54, %v1357_v55 }
 0xb21   :  { %vm1407_vm6 = vcmp.eq.s32.totalorder %v2616_v9, %v1375_v42  ;;  %v2846_v59 = vsel %vm1747_vm5, %v1744_v43, %v1375_v42 }
 0xb22   :  { %v2849_v7 = vsel %vm1747_vm5, %v1743_v41, %v1360_v11  ;;  %vm1406_vm7 = vcmp.eq.s32.totalorder %v2616_v9, %v1360_v11  ;;  %v1862_v46 = vsel %vm1407_vm6, 1.0, %v2375_v10 }
 0xb23   :  { %v1861_v57 = vsel %vm1406_vm7, 1.0, %v2375_v10 }
 0xb24   :  { %2132 = vmatprep.mubr.msk.f32.mxu0 %vm653_vm11, %v1861_v57 }
 0xb25   :  { %2133 = vmatmul.mubr.msk.f32.vlgmr.msra.gmra.mrb[8].mxu0 %vm653_vm11, %v1862_v46 }
 0xb26   :  { %2293 = vmatpush3.bf16.xpose.msk.msra.mxu0 %vm2451_vm1, %v2288_v38 }
 0xb27   :  { %2296 = vmatprep.subr.msk.bf16.mxu0 %vm2451_vm1, %v2294_v45 }
 0xb2d   :  { %v1401_v48 = vpop.xlane.xlu0 %1400 }
 0xb2e   :  { %v1402_v17 = vcvt.f32.s32 %v1401_v48  ;;  %v1386_v52 = vpop.xlane.xlu1 %1385  ;;  %2299 = vmatpush3.bf16.xpose.msk.msra.mxu0 %vm2451_vm1, %v2294_v45 }
 0xb2f   :  { %v1387_v56 = vcvt.f32.s32 %v1386_v52  ;;  %2302 = vmatprep.subr.msk.bf16.mxu0 %vm2451_vm1, %v2300_v50 }
 0xb30   :  { %v1405_v24 = vadd.s32 %v1404_v51, %v1402_v17 }
 0xb31   :  { %v1390_v60 = vadd.s32 %v1389_v53, %v1387_v56 }
 0xb32   :  { %v2883_v0 = vsel %vm1747_vm5, %v1746_v27, %v1405_v24  ;;  %vm1409_vm8 = vcmp.eq.s32.totalorder %v2616_v9, %v1405_v24 }
 0xb33   :  { %v2887_v28 = vsel %vm1747_vm5, %v1745_v63, %v1390_v60  ;;  %vm1408_vm9 = vcmp.eq.s32.totalorder %v2616_v9, %v1390_v60  ;;  %v1864_v32 = vsel %vm1409_vm8, 1.0, %v2375_v10 }
 0xb34   :  { %v1863_v3 = vsel %vm1408_vm9, 1.0, %v2375_v10 }
 0xb35   :  { %2135 = vmatprep.mubr.msk.f32.mxu0 %vm653_vm11, %v1863_v3 }
 0xb36   :  { %2136 = vmatmul.mubr.msk.f32.gmra.mrb[10].mxu0 %vm653_vm11, %v1864_v32 }
 0xb37   :  { %2305 = vmatpush3.bf16.xpose.msk.msra.mxu0 %vm2451_vm1, %v2300_v50 }
 0xb38   :  { %2308 = vmatprep.subr.msk.bf16.mxu0 %vm2451_vm1, %v2306_v1 }
 0xb3f   :  { %2311 = vmatpush3.bf16.xpose.msk.msra.mxu0 %vm2451_vm1, %v2306_v1 }
 0xbf8   :  { %v2134_v19 = vpop.f32.mrb[8].mxu0 }
 0xbf9   :  { %v1496_v4 = vpop.f32.mrb[9].mxu0  ;;  %v1516_v5 = vsub.f32 %v2793_v14, %v2134_v19 }
 0xbfa   :  { %v1515_v2 = vsub.f32 %v2790_v13, %v1496_v4  ;;  %v1889_v13 = vld [vmem:[%s2953_s6 + $0x3] ss:$0 sm:$0xff] }
 0xbfc   :  { %2154 = vmatprep.mubr.msk.f32.mxu0 %vm518_vm0, %v1515_v2 }
 0xbfd   :  { %2155 = vmatmul.mubr.msk.f32.vlgmr.msra.gmra.mrb[12].mxu0 %vm518_vm0, %v1516_v5 }
 0xc09   :  { %v2137_v10 = vpop.f32.mrb[10].mxu0 }
 0xc0a   :  { %v1506_v35 = vpop.f32.mrb[11].mxu0  ;;  %v1518_v12 = vsub.f32 %v2803_v18, %v2137_v10 }
 0xc0b   :  { %v1517_v6 = vsub.f32 %v2800_v39, %v1506_v35 }
 0xc0d   :  { %2157 = vmatprep.mubr.msk.f32.mxu0 %vm518_vm0, %v1517_v6 }
 0xc0e   :  { %2158 = vmatmul.mubr.msk.f32.gmra.mrb[14].mxu0 %vm518_vm0, %v1518_v12 }
 0xcd0   :  { %v2156_v20 = vpop.f32.mrb[12].mxu0 }
 0xcd1   :  { %v1651_v14 = vmul.f32 2.0, %v2156_v20  ;;  %v1630_v15 = vpop.f32.mrb[13].mxu0 }
 0xcd2   :  { %v1650_v16 = vmul.f32 2.0, %v1630_v15 }
 0xcd3   :  { %v1659_v33 = vsub.f32 %v1889_v13, %v1651_v14 }
 0xcd4   :  { %v1658_v34 = vsub.f32 %v1889_v13, %v1650_v16 }
 0xcd5   :  { %v1665_v22 = vsel %vm653_vm11, %v1659_v33, inf }
 0xcd6   :  { %1666 = vmin.xlane.f32.xlu0 %v1665_v22  ;;  %v1662_v39 = vsel %vm653_vm11, %v1658_v34, inf }
 0xcd7   :  { %1663 = vmin.xlane.f32.xlu1 %v1662_v39 }
 0xce1   :  { %v2159_v18 = vpop.f32.mrb[14].mxu0 }
 0xce2   :  { %v1653_v23 = vmul.f32 2.0, %v2159_v18  ;;  %v1640_v25 = vpop.f32.mrb[15].mxu0 }
 0xce3   :  { %v1652_v26 = vmul.f32 2.0, %v1640_v25 }
 0xce4   :  { %v1661_v38 = vsub.f32 %v1889_v13, %v1653_v23 }
 0xce5   :  { %v1660_v29 = vsub.f32 %v1889_v13, %v1652_v26 }
 0xce6   :  { %v1671_v40 = vsel %vm653_vm11, %v1661_v38, inf }
 0xce7   :  { %1672 = vmin.xlane.f32.xlu0 %v1671_v40  ;;  %v1668_v30 = vsel %vm653_vm11, %v1660_v29, inf }
 0xce8   :  { %1669 = vmin.xlane.f32.xlu1 %v1668_v30 }
 0xd63   :  { %v1667_v31 = vpop.xlane.xlu0 %1666 }
 0xd64   :  { %vm1675_vm0 = vcmp.eq.f32.partialorder %v1659_v33, %v1667_v31  ;;  %v1664_v36 = vpop.xlane.xlu1 %1663 }
 0xd65   :  { %v1679_v37 = vsel %vm1675_vm0, %v2616_v9, 64  ;;  %vm1674_vm1 = vcmp.eq.f32.partialorder %v1658_v34, %v1664_v36 }
 0xd66   :  { %v1697_v54 = vsel %vm653_vm11, %v1679_v37, 2147483647  ;;  %v1678_v55 = vsel %vm1674_vm1, %v2616_v9, 64 }
 0xd67   :  { %v1682_v42 = vsel %vm653_vm11, %v1678_v55, 2147483647  ;;  %v1699_v43 = vshra.s32 %v1697_v54, 16  ;;  %v1698_v51 = vand.u32 65535, %v1697_v54 }
 0xd68   :  { %v1684_v11 = vshra.s32 %v1682_v42, 16  ;;  %v1683_v17 = vand.u32 65535, %v1682_v42 }
 0xd69   :  { %v1701_v44 = vcvt.s32.f32 %v1699_v43  ;;  %v1700_v53 = vcvt.s32.f32 %v1698_v51 }
 0xd6a   :  { %v1686_v58 = vcvt.s32.f32 %v1684_v11  ;;  %v1685_v24 = vcvt.s32.f32 %v1683_v17 }
 0xd6b   :  { %1702 = vmin.xlane.f32.xlu0 %v1701_v44 }
 0xd6c   :  { %1687 = vmin.xlane.f32.xlu1 %v1686_v58 }
 0xd74   :  { %v1673_v41 = vpop.xlane.xlu0 %1672 }
 0xd75   :  { %vm1677_vm10 = vcmp.eq.f32.partialorder %v1661_v38, %v1673_v41  ;;  %v1670_v57 = vpop.xlane.xlu1 %1669 }
 0xd76   :  { %v1681_v45 = vsel %vm1677_vm10, %v2616_v9, 64  ;;  %vm1676_vm12 = vcmp.eq.f32.partialorder %v1660_v29, %v1670_v57 }
 0xd77   :  { %v1727_v46 = vsel %vm653_vm11, %v1681_v45, 2147483647  ;;  %v1680_v8 = vsel %vm1676_vm12, %v2616_v9, 64 }
 0xd78   :  { %v1712_v21 = vsel %vm653_vm11, %v1680_v8, 2147483647  ;;  %v1729_v47 = vshra.s32 %v1727_v46, 16  ;;  %v1728_v9 = vand.u32 65535, %v1727_v46 }
 0xd79   :  { %v1714_v49 = vshra.s32 %v1712_v21, 16  ;;  %v1713_v61 = vand.u32 65535, %v1712_v21 }
 0xd7a   :  { %v1731_v50 = vcvt.s32.f32 %v1729_v47  ;;  %v1730_v63 = vcvt.s32.f32 %v1728_v9 }
 0xd7b   :  { %v1716_v48 = vcvt.s32.f32 %v1714_v49  ;;  %v1715_v1 = vcvt.s32.f32 %v1713_v61 }
 0xd7c   :  { %1732 = vmin.xlane.f32.xlu0 %v1731_v50 }
 0xd7d   :  { %1717 = vmin.xlane.f32.xlu1 %v1716_v48 }
 0xdf8   :  { %v1703_v52 = vpop.xlane.xlu0 %1702 }
 0xdf9   :  { %v1688_v56 = vpop.xlane.xlu1 %1687  ;;  %vm1704_vm13 = vcmp.eq.f32.partialorder %v1701_v44, %v1703_v52  ;;  %v1709_v4 = vcvt.f32.s32 %v1703_v52 }
 0xdfa   :  { %v1705_v27 = vsel %vm1704_vm13, %v1700_v53, inf  ;;  %vm1689_vm14 = vcmp.eq.f32.partialorder %v1686_v58, %v1688_v56  ;;  %v1694_v2 = vcvt.f32.s32 %v1688_v56 }
 0xdfb   :  { %1706 = vmin.xlane.f32.xlu0 %v1705_v27  ;;  %v1690_v60 = vsel %vm1689_vm14, %v1685_v24, inf  ;;  %v1710_v10 = vshll.u32 %v1709_v4, 16 }
 0xdfc   :  { %1691 = vmin.xlane.f32.xlu1 %v1690_v60  ;;  %v1695_v12 = vshll.u32 %v1694_v2, 16 }
 0xe09   :  { %v1733_v62 = vpop.xlane.xlu0 %1732 }
 0xe0a   :  { %v1718_v3 = vpop.xlane.xlu1 %1717  ;;  %vm1734_vm11 = vcmp.eq.f32.partialorder %v1731_v50, %v1733_v62  ;;  %v1739_v33 = vcvt.f32.s32 %v1733_v62 }
 0xe0b   :  { %v1735_v32 = vsel %vm1734_vm11, %v1730_v63, inf  ;;  %vm1719_vm15 = vcmp.eq.f32.partialorder %v1716_v48, %v1718_v3  ;;  %v1724_v34 = vcvt.f32.s32 %v1718_v3 }
 0xe0c   :  { %1736 = vmin.xlane.f32.xlu0 %v1735_v32  ;;  %v1720_v19 = vsel %vm1719_vm15, %v1715_v1, inf  ;;  %v1740_v39 = vshll.u32 %v1739_v33, 16 }
 0xe0d   :  { %1721 = vmin.xlane.f32.xlu1 %v1720_v19 }
 0xe88   :  { %v1707_v5 = vpop.xlane.xlu0 %1706 }
 0xe89   :  { %v1708_v35 = vcvt.f32.s32 %v1707_v5  ;;  %v1692_v6 = vpop.xlane.xlu1 %1691 }
 0xe8a   :  { %v1693_v20 = vcvt.f32.s32 %v1692_v6 }
 0xe8b   :  { %v1711_v13 = vadd.s32 %v1710_v10, %v1708_v35 }
 0xe8c   :  { %v1696_v14 = vadd.s32 %v1695_v12, %v1693_v20 }
 0xe8d   :  { %v1754_v15 = vsel %vm1752_vm2, %v2846_v59, %v1711_v13  ;;  %v1725_v59 = vshll.u32 %v1724_v34, 16 }
 0xe8e   :  { %1759 = vst.msk [vmem:[%s2954_s7 + $0x8] sm:$0xff] %vm1757_vm3, %v1754_v15  ;;  %v1753_v16 = vsel %vm1752_vm2, %v2849_v7, %v1696_v14 }
 0xe8f   :  { %1758 = vst.msk [vmem:[%s2954_s7] sm:$0xff] %vm1757_vm3, %v1753_v16 }
 0xe99   :  { %v1737_v22 = vpop.xlane.xlu0 %1736 }
 0xe9a   :  { %v1738_v18 = vcvt.f32.s32 %v1737_v22  ;;  %v1722_v23 = vpop.xlane.xlu1 %1721 }
 0xe9b   :  { %v1723_v25 = vcvt.f32.s32 %v1722_v23 }
 0xe9c   :  { %v1741_v26 = vadd.s32 %v1740_v39, %v1738_v18 }
 0xe9d   :  { %v1726_v38 = vadd.s32 %v1725_v59, %v1723_v25 }
 0xe9e   :  { %v1756_v29 = vsel %vm1752_vm2, %v2883_v0, %v1741_v26 }
 0xe9f   :  { %1761 = vst.msk [vmem:[%s2954_s7 + $0x18] sm:$0xff] %vm1757_vm3, %v1756_v29  ;;  %v1755_v7 = vsel %vm1752_vm2, %v2887_v28, %v1726_v38 }
 0xea0   :  { %1760 = vst.msk [vmem:[%s2954_s7 + $0x10] sm:$0xff] %vm1757_vm3, %v1755_v7 }

</bundles_post_ra>
